<compile_context>
chip_gen: v7x
topology: tpu7x:2x2x1
jax: 0.10.0
libtpu: 0.0.40
codegen_flags: <defaults>
</compile_context>

<pallas_src>
import math
import numpy as np

import jax
import jax.numpy as jnp
from jax.experimental import pallas as pl
from jax.experimental.pallas import tpu as pltpu


# ---------------------------------------------------------------------------
# Tiling helpers
# ---------------------------------------------------------------------------

def _round_up(x, m):
    return ((x + m - 1) // m) * m


def _row_tile(rows, per_row_bytes, budget=24 * 1024 * 1024, max_tile=1024):
    """Sublane-aligned row tile: as big as the VMEM budget allows (<=1024),
    but at least 2 grid steps when possible (v7x has 2 TensorCores)."""
    tm = max(8, min(max_tile, (budget // max(per_row_bytes, 1)) // 8 * 8))
    tm = min(tm, _round_up(rows, 8))
    while tm > 8 and pl.cdiv(rows, tm) < 2:
        tm = max(8, _round_up(tm // 2, 8))
    return tm


_VMEM_LIMIT = 64 * 1024 * 1024  # <= physical VMEM on v5e/v6e (128MiB) and v7x (64MiB)


# ---------------------------------------------------------------------------
# Kernels
# ---------------------------------------------------------------------------

def _make_dual_chain_kernel(n):
    """One fused kernel: season chain (bottom-up) + trend chain (top-down)
    + per-scale (s_i + u_i) sums, for one row tile of the (B*C, T) slabs.

    Ref layout (positional):
      inputs : n season slabs (scale 0..n-1),
               n trend slabs  (chain order: scale n-1 .. 0),
               4*(n-1) season weight refs (W1^T, b1, W2^T, b2 per step),
               4*(n-1) trend  weight refs,
      outputs: n su slabs (scale order 0..n-1).
    """

    def kernel(*refs):
        season = refs[:n]
        trend = refs[n:2 * n]
        sw = refs[2 * n:2 * n + 4 * (n - 1)]
        tw = refs[2 * n + 4 * (n - 1):2 * n + 8 * (n - 1)]
        out = refs[2 * n + 8 * (n - 1):]

        def mlp(h, wrefs, k):
            w1 = wrefs[4 * k][...]
            b1 = wrefs[4 * k + 1][...]
            w2 = wrefs[4 * k + 2][...]
            b2 = wrefs[4 * k + 3][...]
            z1 = jnp.dot(h.astype(jnp.bfloat16), w1,
                         preferred_element_type=jnp.float32) + b1
            g = jax.nn.gelu(z1, approximate=True)   # tanh approx (see TODO)
            return jnp.dot(g.astype(jnp.bfloat16), w2,
                           preferred_element_type=jnp.float32) + b2

        # --- trend chain (top-down): u_{n-1} = trend[n-1];
        #     u_{n-2-k} = trend[n-2-k] + MLP_k(u_{n-1-k})
        u = [None] * n
        h = trend[0][...]
        u[n - 1] = h
        for k in range(n - 1):
            h = trend[k + 1][...] + mlp(h, tw, k)
            u[n - 2 - k] = h

        # --- season chain (bottom-up), emitting su_i = s_i + u_i as we go.
        h = season[0][...]
        out[0][...] = (h + u[0]).astype(out[0].dtype)
        for k in range(n - 1):
            h = season[k + 1][...] + mlp(h, sw, k)
            out[k + 1][...] = (h + u[k + 1]).astype(out[k + 1].dtype)

    return kernel


def _fuse_out_kernel(su_ref, x_ref, w_ref, b_ref, out_ref):
    """out = x + (s+u)^T @ W_out^T + b_out, rows of one scale.

    su_ref : (TM, C) f32   (season+trend), already in (.., T, C) row layout
    x_ref  : (TM, C) f32   original x rows
    w_ref  : (C, C)  bf16  (= W_out^T)
    b_ref  : (1, C)  f32
    """
    su = su_ref[...].astype(jnp.bfloat16)
    z = jnp.dot(su, w_ref[...], preferred_element_type=jnp.float32) + b_ref[...]
    out_ref[...] = (x_ref[...] + z).astype(out_ref.dtype)


# ---------------------------------------------------------------------------
# Pallas wrappers
# ---------------------------------------------------------------------------

def _dual_chain(season_slabs, trend_slabs, sw, tw, Ts):
    """Run both mixing chains + the s+u adds in a single pallas_call.

    season_slabs[i] : (R, T_i)  f32, scale order
    trend_slabs[j]  : (R, T_{n-1-j}) f32, chain order (coarsest first)
    sw / tw         : per-step (W1^T bf16, b1 f32(1,T), W2^T bf16, b2 f32(1,T))
    Returns [su_0, ..., su_{n-1}], su_i of shape (R, T_i) f32.
    """
    n = len(season_slabs)
    R = season_slabs[0].shape[0]
    sum_t = sum(Ts)
    # per-row VMEM (f32): 2x double-buffered inputs (season+trend) +
    # double-buffered outputs + live chain values; ~32*sum_t bytes per row.
    TM = _row_tile(R, per_row_bytes=32 * sum_t)

    args, in_specs = [], []
    for a in season_slabs + trend_slabs:
        args.append(a)
        in_specs.append(pl.BlockSpec((TM, a.shape[1]), lambda r: (r, 0)))
    for params in (sw, tw):
        for p in params:
            for w in p:
                args.append(w)
                in_specs.append(pl.BlockSpec(w.shape, lambda r: (0, 0)))

    out_specs = [pl.BlockSpec((TM, Ts[i]), lambda r: (r, 0)) for i in range(n)]
    out_shapes = tuple(jax.ShapeDtypeStruct((R, Ts[i]), jnp.float32)
                       for i in range(n))

    outs = pl.pallas_call(
        _make_dual_chain_kernel(n),
        out_shape=out_shapes,
        grid_spec=pltpu.PrefetchScalarGridSpec(
            num_scalar_prefetch=0,
            grid=(pl.cdiv(R, TM),),          # ragged last block: masked stores
            in_specs=in_specs,
            out_specs=out_specs),
        compiler_params=pltpu.CompilerParams(
            dimension_semantics=("parallel",),
            vmem_limit_bytes=_VMEM_LIMIT),
    )(*args)
    return list(outs)


def _fuse_out(su2d, x2d, wout_t, bout2):
    """out = x + su @ W_out^T + b_out over a (R, C) row slab (one scale)."""
    R, C = su2d.shape
    TM = _row_tile(R, per_row_bytes=3 * 4 * C * 2)   # su + x + out, f32, x2 buffers
    return pl.pallas_call(
        _fuse_out_kernel,
        out_shape=jax.ShapeDtypeStruct((R, C), jnp.float32),
        grid_spec=pltpu.PrefetchScalarGridSpec(
            num_scalar_prefetch=0,
            grid=(pl.cdiv(R, TM),),
            in_specs=[
                pl.BlockSpec((TM, C), lambda r: (r, 0)),   # s+u rows
                pl.BlockSpec((TM, C), lambda r: (r, 0)),   # original x rows
                pl.BlockSpec(wout_t.shape, lambda r: (0, 0)),  # W_out^T (bf16)
                pl.BlockSpec(bout2.shape, lambda r: (0, 0)),   # b_out
            ],
            out_specs=pl.BlockSpec((TM, C), lambda r: (r, 0)),
        ),
        compiler_params=pltpu.CompilerParams(
            dimension_semantics=("parallel",),
            vmem_limit_bytes=_VMEM_LIMIT),
    )(su2d, x2d, wout_t, bout2)


# ---------------------------------------------------------------------------
# Full Fusion_Linear forward
# ---------------------------------------------------------------------------

def fusion_linear_forward(x_list, season_list, trend_list,
                          season_params, trend_params, wout, bout):
    """Mirrors Fusion_Linear.forward.

    x_list[i]      : (B, T_i, C)
    season_list[i] : (B, C, T_i)
    trend_list[i]  : (B, C, T_i)
    season_params  : list (num_scales-1) of (W1, b1, W2, b2), bottom-up order.
    trend_params   : list (num_scales-1) of (W1, b1, W2, b2), ModuleList order
                     (coarsest->finest, i.e. reversed(range)).
    Returns list of (B, T_i, C).
    """
    num = len(season_list)
    assert num >= 2
    B, C, _ = season_list[0].shape
    R = B * C
    Ts = [s.shape[-1] for s in season_list]

    def prep(p):
        w1, b1, w2, b2 = p
        return (w1.T.astype(jnp.bfloat16),
                b1.reshape(1, -1).astype(jnp.float32),
                w2.T.astype(jnp.bfloat16),
                b2.reshape(1, -1).astype(jnp.float32))

    season_slabs = [s.reshape(R, s.shape[-1]) for s in season_list]
    trend_slabs = [trend_list[num - 1 - j].reshape(R, trend_list[num - 1 - j].shape[-1])
                   for j in range(num)]                      # chain order
    sw = [prep(p) for p in season_params]
    tw = [prep(p) for p in trend_params]

    # --- one fused pallas_call: both chains + (s_i + u_i), per scale.
    su_slabs = _dual_chain(season_slabs, trend_slabs, sw, tw, Ts)

    # --- fused out_linear + bias + residual, one small call per scale.
    wout_t = wout.T.astype(jnp.bfloat16)
    bout2 = bout.reshape(1, -1).astype(jnp.float32)
    outs = []
    for i in range(num):
        su_t = jnp.transpose(su_slabs[i].reshape(B, C, Ts[i]), (0, 2, 1))  # (B,T,C)
        out2d = _fuse_out(su_t.reshape(B * Ts[i], C),
                          x_list[i].reshape(B * Ts[i], C),
                          wout_t, bout2)
        outs.append(out2d.reshape(B, Ts[i], C))
    # (the original `out[:, :length, :]` slice is a no-op: length == T_i)
    return outs


# ---------------------------------------------------------------------------
# Pure-JAX reference (literal transcription of the PyTorch forward, with the
# same bf16-operand / f32-accumulate matmuls as the kernels)
# ---------------------------------------------------------------------------

def reference(x_list, season_list, trend_list,
              season_params, trend_params, wout, bout):
    def lin(x, w, b):
        return jnp.dot(x.astype(jnp.bfloat16), w.T.astype(jnp.bfloat16),
                       preferred_element_type=jnp.float32) + b

    def mlp(x, p):
        w1, b1, w2, b2 = p
        h = jax.nn.gelu(lin(x, w1, b1), approximate=True)
        return lin(h, w2, b2)

    n = len(season_list)

    # MultiScaleSeasonMixing.forward
    out_high = season_list[0]
    out_low = season_list[1]
    out_season_list = [jnp.transpose(out_high, (0, 2, 1))]
    for i in range(n - 1):
        out_low_res = mlp(out_high, season_params[i])
        out_low = out_low + out_low_res
        out_high = out_low
        if i + 2 <= n - 1:
            out_low = season_list[i + 2]
        out_season_list.append(jnp.transpose(out_high, (0, 2, 1)))

    # MultiScaleTrendMixing.forward
    rev = list(trend_list)[::-1]
    out_low = rev[0]
    out_high = rev[1]
    out_trend_list = [jnp.transpose(out_low, (0, 2, 1))]
    for i in range(n - 1):
        out_high_res = mlp(out_low, trend_params[i])
        out_high = out_high + out_high_res
        out_low = out_high
        if i + 2 <= n - 1:
            out_high = rev[i + 2]
        out_trend_list.append(jnp.transpose(out_low, (0, 2, 1)))
    out_trend_list = out_trend_list[::-1]

    # Fusion_Linear.forward tail
    outs = []
    for ori, se, tr in zip(x_list, out_season_list, out_trend_list):
        out = lin(se + tr, wout, bout)
        out = ori + out
        outs.append(out[:, :ori.shape[1], :])
    return outs


# ---------------------------------------------------------------------------
# Demo / self-test
# ---------------------------------------------------------------------------

if __name__ == "__main__":
    B = 2
    seq_len = 32
    down_sampling_window = 2
    down_sampling_layers = 2
    d_model = 32
    num_scales = down_sampling_layers + 1
    Ts = [seq_len // down_sampling_window ** i for i in range(num_scales)]

    key = jax.random.PRNGKey(0)
    keys = iter(jax.random.split(key, 64))

    def uniform(k, shape, fan_in):
        bound = 1.0 / math.sqrt(fan_in)
        return jax.random.uniform(k, shape, jnp.float32, -bound, bound)

    # Season down-sampling MLPs (bottom-up order).
    season_params = []
    for i in range(down_sampling_layers):
        tin, tout = Ts[i], Ts[i + 1]
        season_params.append((uniform(next(keys), (tout, tin), tin),
                              uniform(next(keys), (tout,), tin),
                              uniform(next(keys), (tout, tout), tout),
                              uniform(next(keys), (tout,), tout)))

    # Trend up-sampling MLPs (ModuleList order = reversed(range(layers))).
    trend_params = []
    for j in range(down_sampling_layers):
        i = down_sampling_layers - 1 - j
        tin, tout = Ts[i + 1], Ts[i]
        trend_params.append((uniform(next(keys), (tout, tin), tin),
                             uniform(next(keys), (tout,), tin),
                             uniform(next(keys), (tout, tout), tout),
                             uniform(next(keys), (tout,), tout)))

    wout = uniform(next(keys), (d_model, d_model), d_model)
    bout = uniform(next(keys), (d_model,), d_model)

    x_list = [jax.random.normal(next(keys), (B, Ts[i], d_model), jnp.float32)
              for i in range(num_scales)]
    season_list = [jax.random.normal(next(keys), (B, d_model, Ts[i]), jnp.float32)
                   for i in range(num_scales)]
    trend_list = [jax.random.normal(next(keys), (B, d_model, Ts[i]), jnp.float32)
                  for i in range(num_scales)]

    outs = fusion_linear_forward(x_list, season_list, trend_list,
                                 season_params, trend_params, wout, bout)
    jax.block_until_ready(outs)

    refs = reference(x_list, season_list, trend_list,
                     season_params, trend_params, wout, bout)
    for o, r in zip(outs, refs):
        np.testing.assert_allclose(np.asarray(o), np.asarray(r),
                                   rtol=5e-3, atol=5e-3)

    print("KERNEL_OK")
</pallas_src>

<mosaic_0001>
module attributes {stable_mosaic.version = 11 : i64} {
  func.func @kernel(%arg0: i32, %arg1: memref<32x32xf32, #tpu.memory_space<vmem>>, %arg2: memref<32x16xf32, #tpu.memory_space<vmem>>, %arg3: memref<32x8xf32, #tpu.memory_space<vmem>>, %arg4: memref<32x8xf32, #tpu.memory_space<vmem>>, %arg5: memref<32x16xf32, #tpu.memory_space<vmem>>, %arg6: memref<32x32xf32, #tpu.memory_space<vmem>>, %arg7: memref<32x16xbf16, #tpu.memory_space<vmem>>, %arg8: memref<1x16xf32, #tpu.memory_space<vmem>>, %arg9: memref<16x16xbf16, #tpu.memory_space<vmem>>, %arg10: memref<1x16xf32, #tpu.memory_space<vmem>>, %arg11: memref<16x8xbf16, #tpu.memory_space<vmem>>, %arg12: memref<1x8xf32, #tpu.memory_space<vmem>>, %arg13: memref<8x8xbf16, #tpu.memory_space<vmem>>, %arg14: memref<1x8xf32, #tpu.memory_space<vmem>>, %arg15: memref<8x16xbf16, #tpu.memory_space<vmem>>, %arg16: memref<1x16xf32, #tpu.memory_space<vmem>>, %arg17: memref<16x16xbf16, #tpu.memory_space<vmem>>, %arg18: memref<1x16xf32, #tpu.memory_space<vmem>>, %arg19: memref<16x32xbf16, #tpu.memory_space<vmem>>, %arg20: memref<1x32xf32, #tpu.memory_space<vmem>>, %arg21: memref<32x32xbf16, #tpu.memory_space<vmem>>, %arg22: memref<1x32xf32, #tpu.memory_space<vmem>>, %arg23: memref<32x32xf32, #tpu.memory_space<vmem>>, %arg24: memref<32x16xf32, #tpu.memory_space<vmem>>, %arg25: memref<32x8xf32, #tpu.memory_space<vmem>>) attributes {dimension_semantics = [#tpu.dimension_semantics<parallel>], iteration_bounds = array<i64: 2>, scalar_prefetch = 0 : i64, scratch_operands = 0 : i64, tpu.core_type = #tpu.core_type<tc>, window_params = [{transform_indices = @transform_0, window_bounds = array<i64: 32, 32>}, {transform_indices = @transform_1, window_bounds = array<i64: 32, 16>}, {transform_indices = @transform_2, window_bounds = array<i64: 32, 8>}, {transform_indices = @transform_3, window_bounds = array<i64: 32, 8>}, {transform_indices = @transform_4, window_bounds = array<i64: 32, 16>}, {transform_indices = @transform_5, window_bounds = array<i64: 32, 32>}, {pipeline_mode = #tpu.pipeline_mode<synchronous>, transform_indices = @transform_6, window_bounds = array<i64: 32, 16>}, {pipeline_mode = #tpu.pipeline_mode<synchronous>, transform_indices = @transform_7, window_bounds = array<i64: 1, 16>}, {pipeline_mode = #tpu.pipeline_mode<synchronous>, transform_indices = @transform_8, window_bounds = array<i64: 16, 16>}, {pipeline_mode = #tpu.pipeline_mode<synchronous>, transform_indices = @transform_9, window_bounds = array<i64: 1, 16>}, {pipeline_mode = #tpu.pipeline_mode<synchronous>, transform_indices = @transform_10, window_bounds = array<i64: 16, 8>}, {pipeline_mode = #tpu.pipeline_mode<synchronous>, transform_indices = @transform_11, window_bounds = array<i64: 1, 8>}, {pipeline_mode = #tpu.pipeline_mode<synchronous>, transform_indices = @transform_12, window_bounds = array<i64: 8, 8>}, {pipeline_mode = #tpu.pipeline_mode<synchronous>, transform_indices = @transform_13, window_bounds = array<i64: 1, 8>}, {pipeline_mode = #tpu.pipeline_mode<synchronous>, transform_indices = @transform_14, window_bounds = array<i64: 8, 16>}, {pipeline_mode = #tpu.pipeline_mode<synchronous>, transform_indices = @transform_15, window_bounds = array<i64: 1, 16>}, {pipeline_mode = #tpu.pipeline_mode<synchronous>, transform_indices = @transform_16, window_bounds = array<i64: 16, 16>}, {pipeline_mode = #tpu.pipeline_mode<synchronous>, transform_indices = @transform_17, window_bounds = array<i64: 1, 16>}, {pipeline_mode = #tpu.pipeline_mode<synchronous>, transform_indices = @transform_18, window_bounds = array<i64: 16, 32>}, {pipeline_mode = #tpu.pipeline_mode<synchronous>, transform_indices = @transform_19, window_bounds = array<i64: 1, 32>}, {pipeline_mode = #tpu.pipeline_mode<synchronous>, transform_indices = @transform_20, window_bounds = array<i64: 32, 32>}, {pipeline_mode = #tpu.pipeline_mode<synchronous>, transform_indices = @transform_21, window_bounds = array<i64: 1, 32>}, {transform_indices = @transform_22, window_bounds = array<i64: 32, 32>}, {transform_indices = @transform_23, window_bounds = array<i64: 32, 16>}, {transform_indices = @transform_24, window_bounds = array<i64: 32, 8>}]} {
    %c0 = arith.constant 0 : index
    %c0_0 = arith.constant 0 : index
    %0 = vector.load %arg4[%c0, %c0_0] : memref<32x8xf32, #tpu.memory_space<vmem>>, vector<32x8xf32>
    %c0_1 = arith.constant 0 : index
    %c0_2 = arith.constant 0 : index
    %1 = vector.load %arg5[%c0_1, %c0_2] : memref<32x16xf32, #tpu.memory_space<vmem>>, vector<32x16xf32>
    %c0_3 = arith.constant 0 : index
    %c0_4 = arith.constant 0 : index
    %2 = vector.load %arg15[%c0_3, %c0_4] : memref<8x16xbf16, #tpu.memory_space<vmem>>, vector<8x16xbf16>
    %c0_5 = arith.constant 0 : index
    %c0_6 = arith.constant 0 : index
    %3 = vector.load %arg16[%c0_5, %c0_6] : memref<1x16xf32, #tpu.memory_space<vmem>>, vector<1x16xf32>
    %c0_7 = arith.constant 0 : index
    %c0_8 = arith.constant 0 : index
    %4 = vector.load %arg17[%c0_7, %c0_8] : memref<16x16xbf16, #tpu.memory_space<vmem>>, vector<16x16xbf16>
    %c0_9 = arith.constant 0 : index
    %c0_10 = arith.constant 0 : index
    %5 = vector.load %arg18[%c0_9, %c0_10] : memref<1x16xf32, #tpu.memory_space<vmem>>, vector<1x16xf32>
    %6 = arith.truncf %0 : vector<32x8xf32> to vector<32x8xbf16>
    %cst = arith.constant dense<0.000000e+00> : vector<32x16xf32>
    %7 = tpu.matmul %6, %2, %cst {dimension_numbers = #tpu.dot_dimension_numbers<[1], [0], [0], [1], [0, 0, 1, 1], [], []>} : vector<32x8xbf16>, vector<8x16xbf16>, vector<32x16xf32> -> vector<32x16xf32>
    %8 = vector.broadcast %3 : vector<1x16xf32> to vector<32x16xf32>
    %9 = arith.addf %7, %8 : vector<32x16xf32>
    %10 = arith.mulf %9, %9 : vector<32x16xf32>
    %11 = arith.mulf %9, %10 : vector<32x16xf32>
    %cst_11 = arith.constant 4.471500e-02 : f32
    %12 = vector.broadcast %cst_11 : f32 to vector<32x16xf32>
    %13 = arith.mulf %12, %11 : vector<32x16xf32>
    %14 = arith.addf %9, %13 : vector<32x16xf32>
    %cst_12 = arith.constant 0.797884583 : f32
    %15 = vector.broadcast %cst_12 : f32 to vector<32x16xf32>
    %16 = arith.mulf %15, %14 : vector<32x16xf32>
    %17 = math.tanh %16 : vector<32x16xf32>
    %cst_13 = arith.constant 1.000000e+00 : f32
    %18 = vector.broadcast %cst_13 : f32 to vector<32x16xf32>
    %19 = arith.addf %18, %17 : vector<32x16xf32>
    %cst_14 = arith.constant 5.000000e-01 : f32
    %20 = vector.broadcast %cst_14 : f32 to vector<32x16xf32>
    %21 = arith.mulf %20, %19 : vector<32x16xf32>
    %22 = arith.mulf %9, %21 : vector<32x16xf32>
    %23 = arith.truncf %22 : vector<32x16xf32> to vector<32x16xbf16>
    %cst_15 = arith.constant dense<0.000000e+00> : vector<32x16xf32>
    %24 = tpu.matmul %23, %4, %cst_15 {dimension_numbers = #tpu.dot_dimension_numbers<[1], [0], [0], [1], [0, 0, 1, 1], [], []>} : vector<32x16xbf16>, vector<16x16xbf16>, vector<32x16xf32> -> vector<32x16xf32>
    %25 = vector.broadcast %5 : vector<1x16xf32> to vector<32x16xf32>
    %26 = arith.addf %24, %25 : vector<32x16xf32>
    %27 = arith.addf %1, %26 : vector<32x16xf32>
    %c0_16 = arith.constant 0 : index
    %c0_17 = arith.constant 0 : index
    %28 = vector.load %arg6[%c0_16, %c0_17] : memref<32x32xf32, #tpu.memory_space<vmem>>, vector<32x32xf32>
    %c0_18 = arith.constant 0 : index
    %c0_19 = arith.constant 0 : index
    %29 = vector.load %arg19[%c0_18, %c0_19] : memref<16x32xbf16, #tpu.memory_space<vmem>>, vector<16x32xbf16>
    %c0_20 = arith.constant 0 : index
    %c0_21 = arith.constant 0 : index
    %30 = vector.load %arg20[%c0_20, %c0_21] : memref<1x32xf32, #tpu.memory_space<vmem>>, vector<1x32xf32>
    %c0_22 = arith.constant 0 : index
    %c0_23 = arith.constant 0 : index
    %31 = vector.load %arg21[%c0_22, %c0_23] : memref<32x32xbf16, #tpu.memory_space<vmem>>, vector<32x32xbf16>
    %c0_24 = arith.constant 0 : index
    %c0_25 = arith.constant 0 : index
    %32 = vector.load %arg22[%c0_24, %c0_25] : memref<1x32xf32, #tpu.memory_space<vmem>>, vector<1x32xf32>
    %33 = arith.truncf %27 : vector<32x16xf32> to vector<32x16xbf16>
    %cst_26 = arith.constant dense<0.000000e+00> : vector<32x32xf32>
    %34 = tpu.matmul %33, %29, %cst_26 {dimension_numbers = #tpu.dot_dimension_numbers<[1], [0], [0], [1], [0, 0, 1, 1], [], []>} : vector<32x16xbf16>, vector<16x32xbf16>, vector<32x32xf32> -> vector<32x32xf32>
    %35 = vector.broadcast %30 : vector<1x32xf32> to vector<32x32xf32>
    %36 = arith.addf %34, %35 : vector<32x32xf32>
    %37 = arith.mulf %36, %36 : vector<32x32xf32>
    %38 = arith.mulf %36, %37 : vector<32x32xf32>
    %cst_27 = arith.constant 4.471500e-02 : f32
    %39 = vector.broadcast %cst_27 : f32 to vector<32x32xf32>
    %40 = arith.mulf %39, %38 : vector<32x32xf32>
    %41 = arith.addf %36, %40 : vector<32x32xf32>
    %cst_28 = arith.constant 0.797884583 : f32
    %42 = vector.broadcast %cst_28 : f32 to vector<32x32xf32>
    %43 = arith.mulf %42, %41 : vector<32x32xf32>
    %44 = math.tanh %43 : vector<32x32xf32>
    %cst_29 = arith.constant 1.000000e+00 : f32
    %45 = vector.broadcast %cst_29 : f32 to vector<32x32xf32>
    %46 = arith.addf %45, %44 : vector<32x32xf32>
    %cst_30 = arith.constant 5.000000e-01 : f32
    %47 = vector.broadcast %cst_30 : f32 to vector<32x32xf32>
    %48 = arith.mulf %47, %46 : vector<32x32xf32>
    %49 = arith.mulf %36, %48 : vector<32x32xf32>
    %50 = arith.truncf %49 : vector<32x32xf32> to vector<32x32xbf16>
    %cst_31 = arith.constant dense<0.000000e+00> : vector<32x32xf32>
    %51 = tpu.matmul %50, %31, %cst_31 {dimension_numbers = #tpu.dot_dimension_numbers<[1], [0], [0], [1], [0, 0, 1, 1], [], []>} : vector<32x32xbf16>, vector<32x32xbf16>, vector<32x32xf32> -> vector<32x32xf32>
    %52 = vector.broadcast %32 : vector<1x32xf32> to vector<32x32xf32>
    %53 = arith.addf %51, %52 : vector<32x32xf32>
    %54 = arith.addf %28, %53 : vector<32x32xf32>
    %c0_32 = arith.constant 0 : index
    %c0_33 = arith.constant 0 : index
    %55 = vector.load %arg1[%c0_32, %c0_33] : memref<32x32xf32, #tpu.memory_space<vmem>>, vector<32x32xf32>
    %56 = arith.addf %55, %54 : vector<32x32xf32>
    %c0_34 = arith.constant 0 : index
    %c0_35 = arith.constant 0 : index
    %57 = vector.load %arg23[%c0_34, %c0_35] : memref<32x32xf32, #tpu.memory_space<vmem>>, vector<32x32xf32>
    tpu.vector_store %arg23[%c0_34, %c0_35], %56 {strides = array<i32>} : memref<32x32xf32, #tpu.memory_space<vmem>>, vector<32x32xf32>,
    %c0_36 = arith.constant 0 : index
    %c0_37 = arith.constant 0 : index
    %58 = vector.load %arg2[%c0_36, %c0_37] : memref<32x16xf32, #tpu.memory_space<vmem>>, vector<32x16xf32>
    %c0_38 = arith.constant 0 : index
    %c0_39 = arith.constant 0 : index
    %59 = vector.load %arg7[%c0_38, %c0_39] : memref<32x16xbf16, #tpu.memory_space<vmem>>, vector<32x16xbf16>
    %c0_40 = arith.constant 0 : index
    %c0_41 = arith.constant 0 : index
    %60 = vector.load %arg8[%c0_40, %c0_41] : memref<1x16xf32, #tpu.memory_space<vmem>>, vector<1x16xf32>
    %c0_42 = arith.constant 0 : index
    %c0_43 = arith.constant 0 : index
    %61 = vector.load %arg9[%c0_42, %c0_43] : memref<16x16xbf16, #tpu.memory_space<vmem>>, vector<16x16xbf16>
    %c0_44 = arith.constant 0 : index
    %c0_45 = arith.constant 0 : index
    %62 = vector.load %arg10[%c0_44, %c0_45] : memref<1x16xf32, #tpu.memory_space<vmem>>, vector<1x16xf32>
    %63 = arith.truncf %55 : vector<32x32xf32> to vector<32x32xbf16>
    %cst_46 = arith.constant dense<0.000000e+00> : vector<32x16xf32>
    %64 = tpu.matmul %63, %59, %cst_46 {dimension_numbers = #tpu.dot_dimension_numbers<[1], [0], [0], [1], [0, 0, 1, 1], [], []>} : vector<32x32xbf16>, vector<32x16xbf16>, vector<32x16xf32> -> vector<32x16xf32>
    %65 = vector.broadcast %60 : vector<1x16xf32> to vector<32x16xf32>
    %66 = arith.addf %64, %65 : vector<32x16xf32>
    %67 = arith.mulf %66, %66 : vector<32x16xf32>
    %68 = arith.mulf %66, %67 : vector<32x16xf32>
    %cst_47 = arith.constant 4.471500e-02 : f32
    %69 = vector.broadcast %cst_47 : f32 to vector<32x16xf32>
    %70 = arith.mulf %69, %68 : vector<32x16xf32>
    %71 = arith.addf %66, %70 : vector<32x16xf32>
    %cst_48 = arith.constant 0.797884583 : f32
    %72 = vector.broadcast %cst_48 : f32 to vector<32x16xf32>
    %73 = arith.mulf %72, %71 : vector<32x16xf32>
    %74 = math.tanh %73 : vector<32x16xf32>
    %cst_49 = arith.constant 1.000000e+00 : f32
    %75 = vector.broadcast %cst_49 : f32 to vector<32x16xf32>
    %76 = arith.addf %75, %74 : vector<32x16xf32>
    %cst_50 = arith.constant 5.000000e-01 : f32
    %77 = vector.broadcast %cst_50 : f32 to vector<32x16xf32>
    %78 = arith.mulf %77, %76 : vector<32x16xf32>
    %79 = arith.mulf %66, %78 : vector<32x16xf32>
    %80 = arith.truncf %79 : vector<32x16xf32> to vector<32x16xbf16>
    %cst_51 = arith.constant dense<0.000000e+00> : vector<32x16xf32>
    %81 = tpu.matmul %80, %61, %cst_51 {dimension_numbers = #tpu.dot_dimension_numbers<[1], [0], [0], [1], [0, 0, 1, 1], [], []>} : vector<32x16xbf16>, vector<16x16xbf16>, vector<32x16xf32> -> vector<32x16xf32>
    %82 = vector.broadcast %62 : vector<1x16xf32> to vector<32x16xf32>
    %83 = arith.addf %81, %82 : vector<32x16xf32>
    %84 = arith.addf %58, %83 : vector<32x16xf32>
    %85 = arith.addf %84, %27 : vector<32x16xf32>
    %c0_52 = arith.constant 0 : index
    %c0_53 = arith.constant 0 : index
    %86 = vector.load %arg24[%c0_52, %c0_53] : memref<32x16xf32, #tpu.memory_space<vmem>>, vector<32x16xf32>
    tpu.vector_store %arg24[%c0_52, %c0_53], %85 {strides = array<i32>} : memref<32x16xf32, #tpu.memory_space<vmem>>, vector<32x16xf32>,
    %c0_54 = arith.constant 0 : index
    %c0_55 = arith.constant 0 : index
    %87 = vector.load %arg3[%c0_54, %c0_55] : memref<32x8xf32, #tpu.memory_space<vmem>>, vector<32x8xf32>
    %c0_56 = arith.constant 0 : index
    %c0_57 = arith.constant 0 : index
    %88 = vector.load %arg11[%c0_56, %c0_57] : memref<16x8xbf16, #tpu.memory_space<vmem>>, vector<16x8xbf16>
    %c0_58 = arith.constant 0 : index
    %c0_59 = arith.constant 0 : index
    %89 = vector.load %arg12[%c0_58, %c0_59] : memref<1x8xf32, #tpu.memory_space<vmem>>, vector<1x8xf32>
    %c0_60 = arith.constant 0 : index
    %c0_61 = arith.constant 0 : index
    %90 = vector.load %arg13[%c0_60, %c0_61] : memref<8x8xbf16, #tpu.memory_space<vmem>>, vector<8x8xbf16>
    %c0_62 = arith.constant 0 : index
    %c0_63 = arith.constant 0 : index
    %91 = vector.load %arg14[%c0_62, %c0_63] : memref<1x8xf32, #tpu.memory_space<vmem>>, vector<1x8xf32>
    %92 = arith.truncf %84 : vector<32x16xf32> to vector<32x16xbf16>
    %cst_64 = arith.constant dense<0.000000e+00> : vector<32x8xf32>
    %93 = tpu.matmul %92, %88, %cst_64 {dimension_numbers = #tpu.dot_dimension_numbers<[1], [0], [0], [1], [0, 0, 1, 1], [], []>} : vector<32x16xbf16>, vector<16x8xbf16>, vector<32x8xf32> -> vector<32x8xf32>
    %94 = vector.broadcast %89 : vector<1x8xf32> to vector<32x8xf32>
    %95 = arith.addf %93, %94 : vector<32x8xf32>
    %96 = arith.mulf %95, %95 : vector<32x8xf32>
    %97 = arith.mulf %95, %96 : vector<32x8xf32>
    %cst_65 = arith.constant 4.471500e-02 : f32
    %98 = vector.broadcast %cst_65 : f32 to vector<32x8xf32>
    %99 = arith.mulf %98, %97 : vector<32x8xf32>
    %100 = arith.addf %95, %99 : vector<32x8xf32>
    %cst_66 = arith.constant 0.797884583 : f32
    %101 = vector.broadcast %cst_66 : f32 to vector<32x8xf32>
    %102 = arith.mulf %101, %100 : vector<32x8xf32>
    %103 = math.tanh %102 : vector<32x8xf32>
    %cst_67 = arith.constant 1.000000e+00 : f32
    %104 = vector.broadcast %cst_67 : f32 to vector<32x8xf32>
    %105 = arith.addf %104, %103 : vector<32x8xf32>
    %cst_68 = arith.constant 5.000000e-01 : f32
    %106 = vector.broadcast %cst_68 : f32 to vector<32x8xf32>
    %107 = arith.mulf %106, %105 : vector<32x8xf32>
    %108 = arith.mulf %95, %107 : vector<32x8xf32>
    %109 = arith.truncf %108 : vector<32x8xf32> to vector<32x8xbf16>
    %cst_69 = arith.constant dense<0.000000e+00> : vector<32x8xf32>
    %110 = tpu.matmul %109, %90, %cst_69 {dimension_numbers = #tpu.dot_dimension_numbers<[1], [0], [0], [1], [0, 0, 1, 1], [], []>} : vector<32x8xbf16>, vector<8x8xbf16>, vector<32x8xf32> -> vector<32x8xf32>
    %111 = vector.broadcast %91 : vector<1x8xf32> to vector<32x8xf32>
    %112 = arith.addf %110, %111 : vector<32x8xf32>
    %113 = arith.addf %87, %112 : vector<32x8xf32>
    %114 = arith.addf %113, %0 : vector<32x8xf32>
    %c0_70 = arith.constant 0 : index
    %c0_71 = arith.constant 0 : index
    %115 = vector.load %arg25[%c0_70, %c0_71] : memref<32x8xf32, #tpu.memory_space<vmem>>, vector<32x8xf32>
    tpu.vector_store %arg25[%c0_70, %c0_71], %114 {strides = array<i32>} : memref<32x8xf32, #tpu.memory_space<vmem>>, vector<32x8xf32>,
    return
  }
  func.func @transform_0(%arg0: i32) -> (i32, i32) {
    %c0_i32 = arith.constant 0 : i32
    %c0_i32_0 = arith.constant 0 : i32
    return %arg0, %c0_i32 : i32, i32
  }
  func.func @transform_1(%arg0: i32) -> (i32, i32) {
    %c0_i32 = arith.constant 0 : i32
    %c0_i32_0 = arith.constant 0 : i32
    return %arg0, %c0_i32 : i32, i32
  }
  func.func @transform_2(%arg0: i32) -> (i32, i32) {
    %c0_i32 = arith.constant 0 : i32
    %c0_i32_0 = arith.constant 0 : i32
    return %arg0, %c0_i32 : i32, i32
  }
  func.func @transform_3(%arg0: i32) -> (i32, i32) {
    %c0_i32 = arith.constant 0 : i32
    %c0_i32_0 = arith.constant 0 : i32
    return %arg0, %c0_i32 : i32, i32
  }
  func.func @transform_4(%arg0: i32) -> (i32, i32) {
    %c0_i32 = arith.constant 0 : i32
    %c0_i32_0 = arith.constant 0 : i32
    return %arg0, %c0_i32 : i32, i32
  }
  func.func @transform_5(%arg0: i32) -> (i32, i32) {
    %c0_i32 = arith.constant 0 : i32
    %c0_i32_0 = arith.constant 0 : i32
    return %arg0, %c0_i32 : i32, i32
  }
  func.func @transform_6(%arg0: i32) -> (i32, i32) {
    %c0_i32 = arith.constant 0 : i32
    %c0_i32_0 = arith.constant 0 : i32
    %c0_i32_1 = arith.constant 0 : i32
    return %c0_i32, %c0_i32_0 : i32, i32
  }
  func.func @transform_7(%arg0: i32) -> (i32, i32) {
    %c0_i32 = arith.constant 0 : i32
    %c0_i32_0 = arith.constant 0 : i32
    %c0_i32_1 = arith.constant 0 : i32
    return %c0_i32, %c0_i32_0 : i32, i32
  }
  func.func @transform_8(%arg0: i32) -> (i32, i32) {
    %c0_i32 = arith.constant 0 : i32
    %c0_i32_0 = arith.constant 0 : i32
    %c0_i32_1 = arith.constant 0 : i32
    return %c0_i32, %c0_i32_0 : i32, i32
  }
  func.func @transform_9(%arg0: i32) -> (i32, i32) {
    %c0_i32 = arith.constant 0 : i32
    %c0_i32_0 = arith.constant 0 : i32
    %c0_i32_1 = arith.constant 0 : i32
    return %c0_i32, %c0_i32_0 : i32, i32
  }
  func.func @transform_10(%arg0: i32) -> (i32, i32) {
    %c0_i32 = arith.constant 0 : i32
    %c0_i32_0 = arith.constant 0 : i32
    %c0_i32_1 = arith.constant 0 : i32
    return %c0_i32, %c0_i32_0 : i32, i32
  }
  func.func @transform_11(%arg0: i32) -> (i32, i32) {
    %c0_i32 = arith.constant 0 : i32
    %c0_i32_0 = arith.constant 0 : i32
    %c0_i32_1 = arith.constant 0 : i32
    return %c0_i32, %c0_i32_0 : i32, i32
  }
  func.func @transform_12(%arg0: i32) -> (i32, i32) {
    %c0_i32 = arith.constant 0 : i32
    %c0_i32_0 = arith.constant 0 : i32
    %c0_i32_1 = arith.constant 0 : i32
    return %c0_i32, %c0_i32_0 : i32, i32
  }
  func.func @transform_13(%arg0: i32) -> (i32, i32) {
    %c0_i32 = arith.constant 0 : i32
    %c0_i32_0 = arith.constant 0 : i32
    %c0_i32_1 = arith.constant 0 : i32
    return %c0_i32, %c0_i32_0 : i32, i32
  }
  func.func @transform_14(%arg0: i32) -> (i32, i32) {
    %c0_i32 = arith.constant 0 : i32
    %c0_i32_0 = arith.constant 0 : i32
    %c0_i32_1 = arith.constant 0 : i32
    return %c0_i32, %c0_i32_0 : i32, i32
  }
  func.func @transform_15(%arg0: i32) -> (i32, i32) {
    %c0_i32 = arith.constant 0 : i32
    %c0_i32_0 = arith.constant 0 : i32
    %c0_i32_1 = arith.constant 0 : i32
    return %c0_i32, %c0_i32_0 : i32, i32
  }
  func.func @transform_16(%arg0: i32) -> (i32, i32) {
    %c0_i32 = arith.constant 0 : i32
    %c0_i32_0 = arith.constant 0 : i32
    %c0_i32_1 = arith.constant 0 : i32
    return %c0_i32, %c0_i32_0 : i32, i32
  }
  func.func @transform_17(%arg0: i32) -> (i32, i32) {
    %c0_i32 = arith.constant 0 : i32
    %c0_i32_0 = arith.constant 0 : i32
    %c0_i32_1 = arith.constant 0 : i32
    return %c0_i32, %c0_i32_0 : i32, i32
  }
  func.func @transform_18(%arg0: i32) -> (i32, i32) {
    %c0_i32 = arith.constant 0 : i32
    %c0_i32_0 = arith.constant 0 : i32
    %c0_i32_1 = arith.constant 0 : i32
    return %c0_i32, %c0_i32_0 : i32, i32
  }
  func.func @transform_19(%arg0: i32) -> (i32, i32) {
    %c0_i32 = arith.constant 0 : i32
    %c0_i32_0 = arith.constant 0 : i32
    %c0_i32_1 = arith.constant 0 : i32
    return %c0_i32, %c0_i32_0 : i32, i32
  }
  func.func @transform_20(%arg0: i32) -> (i32, i32) {
    %c0_i32 = arith.constant 0 : i32
    %c0_i32_0 = arith.constant 0 : i32
    %c0_i32_1 = arith.constant 0 : i32
    return %c0_i32, %c0_i32_0 : i32, i32
  }
  func.func @transform_21(%arg0: i32) -> (i32, i32) {
    %c0_i32 = arith.constant 0 : i32
    %c0_i32_0 = arith.constant 0 : i32
    %c0_i32_1 = arith.constant 0 : i32
    return %c0_i32, %c0_i32_0 : i32, i32
  }
  func.func @transform_22(%arg0: i32) -> (i32, i32) {
    %c0_i32 = arith.constant 0 : i32
    %c0_i32_0 = arith.constant 0 : i32
    return %arg0, %c0_i32 : i32, i32
  }
  func.func @transform_23(%arg0: i32) -> (i32, i32) {
    %c0_i32 = arith.constant 0 : i32
    %c0_i32_0 = arith.constant 0 : i32
    return %arg0, %c0_i32 : i32, i32
  }
  func.func @transform_24(%arg0: i32) -> (i32, i32) {
    %c0_i32 = arith.constant 0 : i32
    %c0_i32_0 = arith.constant 0 : i32
    return %arg0, %c0_i32 : i32, i32
  }
}

</mosaic_0001>

<bundles_post_ra>
// kernel: tpu_custom_call.1
= control target key start
LH: loop header
LB: loop body
LE: loop exit
PB: predicated region body
PF: predicated region fallthrough
CT: control target
= control target key end

     0   :  { %s4917_s0 = inlined_call_operand.hbm [shape: f32[64,32], index: 0, kind: input, shape index: {}]   ;;  %s4918_s1 = inlined_call_operand.hbm [shape: f32[64,16], index: 1, kind: input, shape index: {}]   ;;  %s4919_s2 = inlined_call_operand.hbm [shape: f32[64,8], index: 2, kind: input, shape index: {}]   ;;  %s4920_s3 = inlined_call_operand.hbm [shape: f32[64,8], index: 3, kind: input, shape index: {}]   ;;  %s4921_s4 = inlined_call_operand.hbm [shape: f32[64,16], index: 4, kind: input, shape index: {}]   ;;  %s4922_s5 = inlined_call_operand.hbm [shape: f32[64,32], index: 5, kind: input, shape index: {}]   ;;  %s4923_s6 = inlined_call_operand.hbm [shape: bf16[32,16], index: 6, kind: input, shape index: {}]   ;;  %s4924_s7 = inlined_call_operand.hbm [shape: f32[1,16], index: 7, kind: input, shape index: {}]   ;;  %s4925_s8 = inlined_call_operand.hbm [shape: bf16[16,16], index: 8, kind: input, shape index: {}]   ;;  %s4926_s9 = inlined_call_operand.hbm [shape: f32[1,16], index: 9, kind: input, shape index: {}]   ;;  %s4927_s10 = inlined_call_operand.hbm [shape: bf16[16,8], index: 10, kind: input, shape index: {}]   ;;  %s4928_s11 = inlined_call_operand.hbm [shape: f32[1,8], index: 11, kind: input, shape index: {}]   ;;  %s4929_s12 = inlined_call_operand.hbm [shape: bf16[8,8], index: 12, kind: input, shape index: {}]   ;;  %s4930_s13 = inlined_call_operand.hbm [shape: f32[1,8], index: 13, kind: input, shape index: {}]   ;;  %s4931_s14 = inlined_call_operand.hbm [shape: bf16[8,16], index: 14, kind: input, shape index: {}]   ;;  %s4932_s15 = inlined_call_operand.hbm [shape: f32[1,16], index: 15, kind: input, shape index: {}]   ;;  %s4933_s16 = inlined_call_operand.hbm [shape: bf16[16,16], index: 16, kind: input, shape index: {}]   ;;  %s4934_s17 = inlined_call_operand.hbm [shape: f32[1,16], index: 17, kind: input, shape index: {}]   ;;  %s4935_s18 = inlined_call_operand.hbm [shape: bf16[16,32], index: 18, kind: input, shape index: {}]   ;;  %s4936_s19 = inlined_call_operand.hbm [shape: f32[1,32], index: 19, kind: input, shape index: {}]   ;;  %s4937_s20 = inlined_call_operand.hbm [shape: bf16[32,32], index: 20, kind: input, shape index: {}]   ;;  %s4938_s21 = inlined_call_operand.hbm [shape: f32[1,32], index: 21, kind: input, shape index: {}]   ;;  %s4939_s22 = inlined_call_operand.hbm [shape: f32[64,32], index: 22, kind: output, shape index: {0}]   ;;  %s4940_s23 = inlined_call_operand.hbm [shape: f32[64,16], index: 23, kind: output, shape index: {1}]   ;;  %s4941_s24 = inlined_call_operand.hbm [shape: f32[64,8], index: 24, kind: output, shape index: {2}]  }
   0x1   :  { %4997 = sst [smem:[#allocation62_spill]] %s4917_s0 }
   0x2   :  { %4998 = sst [smem:[#allocation63_spill]] %s4918_s1 }
   0x3   :  { %4999 = sst [smem:[#allocation64_spill]] %s4919_s2 }
   0x4   :  { %5000 = sst [smem:[#allocation65_spill]] %s4920_s3 }
   0x5   :  { %5001 = sst [smem:[#allocation66_spill]] %s4921_s4 }
   0x6   :  { %5002 = sst [smem:[#allocation67_spill]] %s4922_s5 }
   0x7   :  { %5003 = sst [smem:[#allocation68_spill]] %s4923_s6 }
   0x8   :  { %5004 = sst [smem:[#allocation69_spill]] %s4924_s7 }
   0x9   :  { %5005 = sst [smem:[#allocation70_spill]] %s4925_s8 }
   0xa   :  { %5006 = sst [smem:[#allocation71_spill]] %s4926_s9 }
   0xb   :  { %5007 = sst [smem:[#allocation72_spill]] %s4927_s10 }
   0xc   :  { %5008 = sst [smem:[#allocation73_spill]] %s4928_s11 }
   0xd   :  { %5009 = sst [smem:[#allocation74_spill]] %s4929_s12 }
   0xe   :  { %5010 = sst [smem:[#allocation75_spill]] %s4930_s13 }
   0xf   :  { %5011 = sst [smem:[#allocation76_spill]] %s4931_s14 }
  0x10   :  { %5012 = sst [smem:[#allocation77_spill]] %s4932_s15 }
  0x11   :  { %5013 = sst [smem:[#allocation78_spill]] %s4933_s16 }
  0x12   :  { %5014 = sst [smem:[#allocation79_spill]] %s4934_s17 }
  0x13   :  { %5015 = sst [smem:[#allocation80_spill]] %s4935_s18 }
  0x14   :  { %5016 = sst [smem:[#allocation81_spill]] %s4936_s19 }
  0x15   :  { %5017 = sst [smem:[#allocation82_spill]] %s4937_s20 }
  0x16   :  { %5018 = sst [smem:[#allocation83_spill]] %s4938_s21 }
  0x17   :  { %5019 = sst [smem:[#allocation84_spill]] %s4939_s22 }
  0x18   :  { %5020 = sst [smem:[#allocation85_spill]] %s4940_s23 }
  0x19   :  { %5021 = sst [smem:[#allocation86_spill]] %s4941_s24 }
  0x1a   :  { %30 = vsyncpa [#allocation3], 0 }
  0x1b   :  { %32 = vsyncpa [#allocation3 + $0x1], 0 }
  0x1c   :  { %33 = vsyncpa [#allocation6], 0 }
  0x1d   :  { %35 = vsyncpa [#allocation6 + $0x1], 0 }
  0x1e   :  { %36 = vsyncpa [#allocation9], 0 }
  0x1f   :  { %38 = vsyncpa [#allocation9 + $0x1], 0 }
  0x20   :  { %39 = vsyncpa [#allocation12], 0 }
  0x21   :  { %41 = vsyncpa [#allocation12 + $0x1], 0 }
  0x22   :  { %42 = vsyncpa [#allocation15], 0 }
  0x23   :  { %43 = vsyncpa [#allocation18], 0 }
  0x24   :  { %44 = vsyncpa [#allocation21], 0 }
  0x25   :  { %45 = vsyncpa [#allocation24], 0 }
  0x26   :  { %46 = vsyncpa [#allocation27], 0 }
  0x27   :  { %47 = vsyncpa [#allocation30], 0 }
  0x28   :  { %48 = vsyncpa [#allocation33], 0 }
  0x29   :  { %49 = vsyncpa [#allocation36], 0 }
  0x2a   :  { %50 = vsyncpa [#allocation4], 0 }
  0x2b   :  { %52 = vsyncpa [#allocation4 + $0x1], 0 }
  0x2c   :  { %53 = vsyncpa [#allocation39], 0 }
  0x2d   :  { %55 = vsyncpa [#allocation39 + $0x1], 0  ;;  %s3880_s5 = smov 0   ;;  %s3882_s26 = smov 0  }
  0x2e   :  { %s3884_s27 = smov 0   ;;  %s3886_s28 = smov 0  }
  0x2f LB: > { %5022 = sst [smem:[#allocation56_spill]] %s3710_s5  ;;  %s3724_s6 = smov [#allocation13]   ;;  %s3722_s28 = sphi %s3886_s28, %s5103_s28   ;;  %s3718_s27 = sphi %s3884_s27, %s5107_s27   ;;  %s3714_s26 = sphi %s3882_s26, %s5106_s26   ;;  %s3710_s5 = sphi %s3880_s5, %s5105_s5  }
  0x30   : > { %5023 = sst [smem:[#allocation57_spill]] %s3722_s28  ;;  %s648_s2 = sshll.u32 %s3724_s6, 4  ;;  %s3906_s2 = int_to_ptr.vmem [resolvable:$true] %s648_s2 }
  0x31   : > { %s3901_s29 = sadd.s32 4294967295, %s3722_s28   ;;  %p2438_p0 = scmp.ge.s32.totalorder %s3722_s28, 1 }
  0x32   : > { %p4962_p1 = scmp.eq.s32.totalorder %s3901_s29, 0  ;;  %p636_p2 = scmp.lt.s32.totalorder %s3722_s28, 3 }
  0x33   : > { %s3725_s7 = smov [#allocation14]   ;;  %s3726_s25 = smov [#allocation17]  }
  0x34   : > { %p3908_p3 = pnand %p2438_p0, %p636_p2  ;;  %s662_s30 = sshll.u32 %s3725_s7, 4  ;;  %s3921_s30 = int_to_ptr.vmem [resolvable:$true] %s662_s30 }
  0x35   : > { %s686_s8 = sshll.u32 %s3726_s25, 4  ;;  %s5027_s6 = sld [smem:[#allocation68_spill]]  ;;  %s3923_s8 = int_to_ptr.vmem [resolvable:$true] %s686_s8 }
  0x36   : > { %s5024_s0 = scalar_select %p3908_p3, 1, 0 }
  0x37   : > { %p2714_p5 = pneg %p3908_p3 }
  0x38   : > { %5025 = sst [smem:[#allocation58_spill]] %s5024_s0 }
  0x39   : > { %p3917_p6 = pnand %p2714_p5, %p4962_p1 }
  0x3b   : > { %s5026_s3 = scalar_select %p3917_p6, 1, 0 }
  0x3c   : > { %s2920_s24 = scalar_lea.hbm %s5027_s6, 256  ;;  %p3933_p8 = pneg %p3917_p6 }
  0x3d   : > { %p2921_p7 = scmp.ne.s32.totalorder %s5027_s6, %s2920_s24  ;;  %p2927_p11 = scmp.lt.u32.totalorder %s2920_s24, %s5027_s6 }
  0x3e   : > { %s5028_s7 = scalar_select %p3933_p8, 1, 0 }
  0x3f   : > { %p2923_p9 = pnand %p3933_p8, %p2921_p7 }
  0x41   : > { %p2924_p10 = pneg %p2923_p9 }
  0x43   : > { %p2929_p12 = pnand %p2927_p11, %p2924_p10 }
  0x45   : > { %2932 = shalt.err (!%p2929_p12)
}
  0x46   : > { %s2933_s22 = scalar_lea.vmem %s3906_s2, 256  ;;  %p2941_p5 = scmp.lt.s32.totalorder %s3906_s2, %s3906_s2 }
  0x47   : > { %p2934_p13 = scmp.ne.s32.totalorder %s3906_s2, %s2933_s22  ;;  %p2942_p4 = scmp.lt.s32.totalorder %s2933_s22, %s2933_s22 }
  0x49   : > { %p2936_p0 = pnand %p2934_p13, %p3933_p8  ;;  %p2943_p7 = por %p2942_p4, %p2941_p5 }
  0x4b   : > { %p2937_p2 = pneg %p2936_p0 }
  0x4d   : > { %p2944_p9 = pnand %p2943_p7, %p2937_p2 }
  0x4f   : > { %2947 = shalt.err (!%p2944_p9)
}
  0x50   : > { %s4960_s23 = smov 64   ;;  %s4965_s24 = smov 4  }
  0x51   : > { %2717 = dma.hbm_to_vmem [thread:$0]  (!%p3917_p6), %s5027_s6, 256, %s3906_s2, [#allocation12], %s4960_s23, %s4960_s23, %s4965_s24  }
  0x52   : > { %s5029_s21 = sld [smem:[#allocation69_spill]] }
  0x58   : > { %s2948_s22 = scalar_lea.hbm %s5029_s21, 16 }
  0x59   : > { %p2949_p4 = scmp.ne.s32.totalorder %s5029_s21, %s2948_s22  ;;  %p2955_p12 = scmp.lt.u32.totalorder %s2948_s22, %s5029_s21 }
  0x5b   : > { %p2951_p10 = pnand %p2949_p4, %p3933_p8 }
  0x5d   : > { %p2952_p11 = pneg %p2951_p10 }
  0x5f   : > { %p2957_p13 = pnand %p2955_p12, %p2952_p11 }
  0x61   : > { %2960 = shalt.err (!%p2957_p13)
}
  0x62   : > { %s2961_s2 = scalar_lea.vmem %s3921_s30, 16  ;;  %s2968_s18 = scalar_lea.vmem %s3921_s30, 32 }
  0x63   : > { %p2962_p0 = scmp.ne.s32.totalorder %s3921_s30, %s2961_s2  ;;  %p2969_p7 = scmp.lt.s32.totalorder %s3921_s30, %s3921_s30 }
  0x64   : > { %p2970_p9 = scmp.lt.s32.totalorder %s2968_s18, %s2961_s2 }
  0x65   : > { %p2964_p2 = pnand %p2962_p0, %p3933_p8 }
  0x66   : > { %p2971_p4 = por %p2970_p9, %p2969_p7 }
  0x67   : > { %p2965_p5 = pneg %p2964_p2 }
  0x69   : > { %p2972_p10 = pnand %p2971_p4, %p2965_p5 }
  0x6b   : > { %2975 = shalt.err (!%p2972_p10)
}
  0x6c   : > { %2720 = dma.hbm_to_vmem [thread:$0]  (!%p3917_p6), %s5029_s21, 16, %s3921_s30, [#allocation15]  }
  0x6d   : > { %s5030_s9 = sld [smem:[#allocation71_spill]] }
  0x73   : > { %s2976_s4 = scalar_lea.hbm %s5030_s9, 16 }
  0x74   : > { %p2977_p11 = scmp.ne.s32.totalorder %s5030_s9, %s2976_s4  ;;  %p2983_p0 = scmp.lt.u32.totalorder %s2976_s4, %s5030_s9 }
  0x76   : > { %p2979_p12 = pnand %p2977_p11, %p3933_p8 }
  0x78   : > { %p2980_p13 = pneg %p2979_p12 }
  0x7a   : > { %p2985_p2 = pnand %p2983_p0, %p2980_p13 }
  0x7c   : > { %2988 = shalt.err (!%p2985_p2)
}
  0x7d   : > { %s2989_s30 = scalar_lea.vmem %s3923_s8, 16  ;;  %s2996_s18 = scalar_lea.vmem %s3923_s8, 32 }
  0x7e   : > { %p2990_p5 = scmp.ne.s32.totalorder %s3923_s8, %s2989_s30  ;;  %p2997_p4 = scmp.lt.s32.totalorder %s3923_s8, %s3923_s8 }
  0x7f   : > { %p2998_p10 = scmp.lt.s32.totalorder %s2996_s18, %s2989_s30 }
  0x80   : > { %p2992_p7 = pnand %p2990_p5, %p3933_p8 }
  0x81   : > { %p2999_p11 = por %p2998_p10, %p2997_p4 }
  0x82   : > { %p2993_p9 = pneg %p2992_p7 }
  0x84   : > { %p3000_p12 = pnand %p2999_p11, %p2993_p9 }
  0x86   : > { %3003 = shalt.err (!%p3000_p12)
}
  0x87   : > { %2726 = dma.hbm_to_vmem [thread:$0]  (!%p3917_p6), %s5030_s9, 16, %s3923_s8, [#allocation18]  }
  0x88   : > { %s3729_s20 = smov [#allocation20]   ;;  %s3730_s4 = smov [#allocation23]  }
  0x89   : > { %s710_s0 = sshll.u32 %s3729_s20, 4  ;;  %s732_s1 = sshll.u32 %s3730_s4, 4  ;;  %s711_s0 = int_to_ptr.vmem [resolvable:$true] %s710_s0  ;;  %s733_s1 = int_to_ptr.vmem [resolvable:$true] %s732_s1 }
  0x8a   : > { %s5031_s11 = sld [smem:[#allocation73_spill]] }
  0x90   : > { %s3004_s2 = scalar_lea.hbm %s5031_s11, 16 }
  0x91   : > { %p3005_p13 = scmp.ne.s32.totalorder %s5031_s11, %s3004_s2  ;;  %p3011_p5 = scmp.lt.u32.totalorder %s3004_s2, %s5031_s11 }
  0x93   : > { %p3007_p0 = pnand %p3005_p13, %p3933_p8 }
  0x95   : > { %p3008_p2 = pneg %p3007_p0 }
  0x97   : > { %p3013_p7 = pnand %p3011_p5, %p3008_p2 }
  0x99   : > { %3016 = shalt.err (!%p3013_p7)
}
  0x9a   : > { %s3017_s8 = scalar_lea.vmem %s711_s0, 16  ;;  %s3024_s16 = scalar_lea.vmem %s711_s0, 32 }
  0x9b   : > { %p3018_p9 = scmp.ne.s32.totalorder %s711_s0, %s3017_s8  ;;  %p3025_p11 = scmp.lt.s32.totalorder %s711_s0, %s711_s0 }
  0x9c   : > { %p3026_p12 = scmp.lt.s32.totalorder %s3024_s16, %s3017_s8 }
  0x9d   : > { %p3020_p4 = pnand %p3018_p9, %p3933_p8 }
  0x9e   : > { %p3027_p1 = por %p3026_p12, %p3025_p11 }
  0x9f   : > { %p3021_p10 = pneg %p3020_p4 }
  0xa1   : > { %p3028_p3 = pnand %p3027_p1, %p3021_p10 }
  0xa3   : > { %3031 = shalt.err (!%p3028_p3)
}
  0xa4   : > { %2732 = dma.hbm_to_vmem [thread:$0]  (!%p3917_p6), %s5031_s11, 16, %s711_s0, [#allocation21]  }
  0xa5   : > { %s5032_s13 = sld [smem:[#allocation75_spill]] }
  0xab   : > { %s3032_s22 = scalar_lea.hbm %s5032_s13, 16 }
  0xac   : > { %p3033_p13 = scmp.ne.s32.totalorder %s5032_s13, %s3032_s22  ;;  %p3039_p3 = scmp.lt.u32.totalorder %s3032_s22, %s5032_s13 }
  0xae   : > { %p3035_p0 = pnand %p3033_p13, %p3933_p8 }
  0xb0   : > { %p3036_p1 = pneg %p3035_p0 }
  0xb2   : > { %p3041_p2 = pnand %p3039_p3, %p3036_p1 }
  0xb4   : > { %3044 = shalt.err (!%p3041_p2)
}
  0xb5   : > { %s3045_s8 = scalar_lea.vmem %s733_s1, 16  ;;  %s3052_s0 = scalar_lea.vmem %s733_s1, 32 }
  0xb6   : > { %p3046_p5 = scmp.ne.s32.totalorder %s733_s1, %s3045_s8  ;;  %p3053_p4 = scmp.lt.s32.totalorder %s733_s1, %s733_s1 }
  0xb7   : > { %p3054_p10 = scmp.lt.s32.totalorder %s3052_s0, %s3045_s8 }
  0xb8   : > { %p3048_p7 = pnand %p3046_p5, %p3933_p8 }
  0xb9   : > { %p3055_p11 = por %p3054_p10, %p3053_p4 }
  0xba   : > { %p3049_p9 = pneg %p3048_p7 }
  0xbc   : > { %p3056_p12 = pnand %p3055_p11, %p3049_p9 }
  0xbe   : > { %3059 = shalt.err (!%p3056_p12)
}
  0xbf   : > { %2738 = dma.hbm_to_vmem [thread:$0]  (!%p3917_p6), %s5032_s13, 16, %s733_s1, [#allocation24]  }
  0xc0   : > { %s3731_s4 = smov [#allocation26]   ;;  %s3732_s25 = smov [#allocation29]  }
  0xc1   : > { %s754_s23 = sshll.u32 %s3731_s4, 4  ;;  %s778_s22 = sshll.u32 %s3732_s25, 4  ;;  %s755_s23 = int_to_ptr.vmem [resolvable:$true] %s754_s23  ;;  %s779_s22 = int_to_ptr.vmem [resolvable:$true] %s778_s22 }
  0xc2   : > { %s5033_s15 = sld [smem:[#allocation77_spill]] }
  0xc8   : > { %s3060_s18 = scalar_lea.hbm %s5033_s15, 16 }
  0xc9   : > { %p3061_p13 = scmp.ne.s32.totalorder %s5033_s15, %s3060_s18  ;;  %p3067_p3 = scmp.lt.u32.totalorder %s3060_s18, %s5033_s15 }
  0xcb   : > { %p3063_p0 = pnand %p3061_p13, %p3933_p8 }
  0xcd   : > { %p3064_p1 = pneg %p3063_p0 }
  0xcf   : > { %p3069_p2 = pnand %p3067_p3, %p3064_p1 }
  0xd1   : > { %3072 = shalt.err (!%p3069_p2)
}
  0xd2   : > { %s3073_s1 = scalar_lea.vmem %s755_s23, 16  ;;  %s3080_s20 = scalar_lea.vmem %s755_s23, 32 }
  0xd3   : > { %p3074_p5 = scmp.ne.s32.totalorder %s755_s23, %s3073_s1  ;;  %p3081_p4 = scmp.lt.s32.totalorder %s755_s23, %s755_s23 }
  0xd4   : > { %p3082_p10 = scmp.lt.s32.totalorder %s3080_s20, %s3073_s1 }
  0xd5   : > { %p3076_p7 = pnand %p3074_p5, %p3933_p8 }
  0xd6   : > { %p3083_p11 = por %p3082_p10, %p3081_p4 }
  0xd7   : > { %p3077_p9 = pneg %p3076_p7 }
  0xd9   : > { %p3084_p12 = pnand %p3083_p11, %p3077_p9 }
  0xdb   : > { %3087 = shalt.err (!%p3084_p12)
}
  0xdc   : > { %2744 = dma.hbm_to_vmem [thread:$0]  (!%p3917_p6), %s5033_s15, 16, %s755_s23, [#allocation27]  }
  0xdd   : > { %s5034_s17 = sld [smem:[#allocation79_spill]] }
  0xe3   : > { %s3088_s18 = scalar_lea.hbm %s5034_s17, 16 }
  0xe4   : > { %p3089_p13 = scmp.ne.s32.totalorder %s5034_s17, %s3088_s18  ;;  %p3095_p3 = scmp.lt.u32.totalorder %s3088_s18, %s5034_s17 }
  0xe6   : > { %p3091_p0 = pnand %p3089_p13, %p3933_p8 }
  0xe8   : > { %p3092_p1 = pneg %p3091_p0 }
  0xea   : > { %p3097_p2 = pnand %p3095_p3, %p3092_p1 }
  0xec   : > { %3100 = shalt.err (!%p3097_p2)
}
  0xed   : > { %s3101_s1 = scalar_lea.vmem %s779_s22, 16  ;;  %s3108_s23 = scalar_lea.vmem %s779_s22, 32 }
  0xee   : > { %p3102_p5 = scmp.ne.s32.totalorder %s779_s22, %s3101_s1  ;;  %p3109_p4 = scmp.lt.s32.totalorder %s779_s22, %s779_s22 }
  0xef   : > { %p3110_p10 = scmp.lt.s32.totalorder %s3108_s23, %s3101_s1 }
  0xf0   : > { %p3104_p7 = pnand %p3102_p5, %p3933_p8 }
  0xf1   : > { %p3111_p11 = por %p3110_p10, %p3109_p4 }
  0xf2   : > { %p3105_p9 = pneg %p3104_p7 }
  0xf4   : > { %p3112_p12 = pnand %p3111_p11, %p3105_p9 }
  0xf6   : > { %3115 = shalt.err (!%p3112_p12)
}
  0xf7   : > { %2750 = dma.hbm_to_vmem [thread:$0]  (!%p3917_p6), %s5034_s17, 16, %s779_s22, [#allocation30]  }
  0xf8   : > { %s3733_s25 = smov [#allocation32]   ;;  %s5035_s19 = sld [smem:[#allocation81_spill]] }
  0xf9   : > { %s802_s2 = sshll.u32 %s3733_s25, 4  ;;  %s803_s2 = int_to_ptr.vmem [resolvable:$true] %s802_s2 }
  0xfe   : > { %s3116_s14 = scalar_lea.hbm %s5035_s19, 16 }
  0xff   : > { %p3117_p13 = scmp.ne.s32.totalorder %s5035_s19, %s3116_s14  ;;  %p3123_p3 = scmp.lt.u32.totalorder %s3116_s14, %s5035_s19 }
 0x101   : > { %p3119_p0 = pnand %p3117_p13, %p3933_p8 }
 0x103   : > { %p3120_p1 = pneg %p3119_p0 }
 0x105   : > { %p3125_p2 = pnand %p3123_p3, %p3120_p1 }
 0x107   : > { %3128 = shalt.err (!%p3125_p2)
}
 0x108   : > { %s3129_s22 = scalar_lea.vmem %s803_s2, 16  ;;  %s3136_s23 = scalar_lea.vmem %s803_s2, 32 }
 0x109   : > { %p3130_p5 = scmp.ne.s32.totalorder %s803_s2, %s3129_s22  ;;  %p3137_p4 = scmp.lt.s32.totalorder %s803_s2, %s803_s2 }
 0x10a   : > { %p3138_p10 = scmp.lt.s32.totalorder %s3136_s23, %s3129_s22 }
 0x10b   : > { %p3132_p7 = pnand %p3130_p5, %p3933_p8 }
 0x10c   : > { %p3139_p11 = por %p3138_p10, %p3137_p4 }
 0x10d   : > { %p3133_p9 = pneg %p3132_p7 }
 0x10f   : > { %p3140_p12 = pnand %p3139_p11, %p3133_p9 }
 0x111   : > { %3143 = shalt.err (!%p3140_p12)
}
 0x112   : > { %2756 = dma.hbm_to_vmem [thread:$0]  (!%p3917_p6), %s5035_s19, 16, %s803_s2, [#allocation33]  }
 0x113   : > { %s4964_s25 = sadd.s32 4294967294, %s3722_s28   ;;  %s4097_s30 = sadd.s32 1, %s3722_s28  }
 0x114   : > { %5036 = sst [smem:[#allocation59_spill]] %s4097_s30  ;;  %s65_s18 = ssub.s32 %s3722_s28, %s4097_s30 }
 0x115   : > { %s68_s14 = sadd.s32 1, %s3718_s27  ;;  %p66_p13 = scmp.eq.s32.totalorder %s65_s18, 0 }
 0x116   : > { %p75_p0 = scmp.ne.s32.totalorder %s3718_s27, %s3714_s26  ;;  %p76_p1 = scmp.eq.s32.totalorder %s3722_s28, 0 }
 0x117   : > { %p81_p3 = scmp.ne.s32.totalorder %s3714_s26, %s3710_s5  ;;  %p5038_p5 = scmp.eq.s32.totalorder %s3901_s29, 0 }
 0x118   : > { %s4108_s8 = scalar_select %p66_p13, %s3718_s27, %s68_s14  }
 0x119   : > { %p77_p2 = por %p76_p1, %p75_p0  ;;  %p4112_p7 = por %p5038_p5, %p81_p3 }
 0x11a   : > { %5037 = sst [smem:[#allocation60_spill]] %s4108_s8  ;;  %p571_p9 = scmp.eq.s32.totalorder %s3901_s29, 1 }
 0x11b   : > { %s5039_s0 = scalar_select %p4112_p7, 1, 0 }
 0x11c   : > { %p577_p4 = scmp.eq.s32.totalorder %s4964_s25, 1  ;;  %p2808_p10 = scmp.lt.s32.totalorder %s3722_s28, 2 }
 0x11d   : > { %s4967_s2 = sand.u32 1, %s3718_s27   ;;  %p4121_p11 = por %p571_p9, %p75_p0 }
 0x11e   : > { %p4125_p12 = por %p577_p4, %p81_p3  ;;  %s4131_s22 = sshll.u32 %s4967_s2, 5 }
 0x11f   : > { %s5040_s16 = scalar_select %p4121_p11, 1, 0 }
 0x120   : > { %s5041_s1 = scalar_select %p4125_p12, 1, 0 }
 0x121   : > { %s4134_s23 = sshll.u32 %s3722_s28, 9  ;;  %p4136_p13 = pnand %p2808_p10, %p77_p2 }
 0x122   : > { %5042 = sst [smem:[#allocation61_spill]] %s5041_s1  ;;  %s4141_s4 = sand.u32 1, %s3722_s28  }
 0x123   : > { %s5043_s20 = scalar_select %p4136_p13, 1, 0 }
 0x124   : > { %s5044_s25 = sld [smem:[#allocation63_spill]]  ;;  %s862_s2 = scalar_lea.vmem [#allocation5], %s4131_s22 }
 0x125   : > { %s869_s6 = sshll.u32 %s862_s2, 4  ;;  %p4157_p1 = pneg %p4136_p13  ;;  %s4150_s6 = int_to_ptr.vmem [resolvable:$true] %s869_s6 }
 0x127   : > { %s5045_s13 = scalar_select %p4157_p1, 1, 0 }
 0x12a   : > { %s4147_s24 = scalar_lea.hbm %s5044_s25, %s4134_s23  ;;  %s3149_s15 = scalar_lea.hbm %s5044_s25, 1024 }
 0x12b   : > { %s3144_s11 = scalar_lea.hbm %s4147_s24, 512  ;;  %p3150_p5 = scmp.lt.u32.totalorder %s4147_s24, %s5044_s25 }
 0x12c   : > { %p3145_p0 = scmp.ne.s32.totalorder %s4147_s24, %s3144_s11  ;;  %p3151_p9 = scmp.lt.u32.totalorder %s3149_s15, %s3144_s11 }
 0x12d   : > { %p3153_p10 = scmp.lt.u32.totalorder %s3144_s11, %s4147_s24 }
 0x12e   : > { %p3147_p3 = pnand %p4157_p1, %p3145_p0  ;;  %p3152_p4 = por %p3151_p9, %p3150_p5 }
 0x130   : > { %p3148_p2 = pneg %p3147_p3  ;;  %p3154_p12 = por %p3153_p10, %p3152_p4 }
 0x132   : > { %p3155_p11 = pnand %p3154_p12, %p3148_p2 }
 0x134   : > { %3158 = shalt.err (!%p3155_p11)
}
 0x135   : > { %s3159_s9 = scalar_lea.vmem %s4150_s6, 512  ;;  %s3734_s18 = smov [#allocation5]  }
 0x136   : > { %p3160_p0 = scmp.ne.s32.totalorder %s4150_s6, %s3159_s9  ;;  %s3164_s14 = sshll.u32 %s3734_s18, 4  ;;  %s3165_s14 = int_to_ptr.vmem [resolvable:$false] %s3164_s14 }
 0x137   : > { %s3166_s17 = scalar_lea.vmem %s3165_s14, 1024  ;;  %p3167_p6 = scmp.lt.s32.totalorder %s4150_s6, %s3165_s14 }
 0x138   : > { %p3162_p3 = pnand %p3160_p0, %p4157_p1  ;;  %p3168_p8 = scmp.lt.s32.totalorder %s3166_s17, %s3159_s9 }
 0x13a   : > { %p3163_p7 = pneg %p3162_p3  ;;  %p3169_p5 = por %p3168_p8, %p3167_p6 }
 0x13c   : > { %p3170_p9 = pnand %p3169_p5, %p3163_p7 }
 0x13e   : > { %3173 = shalt.err (!%p3170_p9)
}
 0x13f   : > { %s4989_s11 = smov 128   ;;  %s4991_s15 = smov 8  }
 0x140   : > { %s5046_s2 = scalar_lea.sflag [#allocation6], %s4141_s4  ;;  %s5047_s14 = sld [smem:[#allocation65_spill]] }
 0x141   : > { %2769 = dma.hbm_to_vmem [thread:$0]  (!%p4136_p13), %s4147_s24, 512, %s4150_s6, %s5046_s2, %s4989_s11, %s4989_s11, %s4991_s15  }
 0x142   : > { %s904_s19 = scalar_lea.vmem [#allocation8], %s4131_s22  ;;  %s4988_s25 = scalar_lea.sflag [#allocation9], %s4141_s4 }
 0x143   : > { %s911_s21 = sshll.u32 %s904_s19, 4  ;;  %s4192_s21 = int_to_ptr.vmem [resolvable:$true] %s911_s21 }
 0x146   : > { %s4189_s17 = scalar_lea.hbm %s5047_s14, %s4134_s23  ;;  %s3179_s2 = scalar_lea.hbm %s5047_s14, 1024 }
 0x147   : > { %s3174_s8 = scalar_lea.hbm %s4189_s17, 512  ;;  %p3180_p11 = scmp.lt.u32.totalorder %s4189_s17, %s5047_s14 }
 0x148   : > { %p3175_p6 = scmp.ne.s32.totalorder %s4189_s17, %s3174_s8  ;;  %p3181_p12 = scmp.lt.u32.totalorder %s3179_s2, %s3174_s8 }
 0x149   : > { %p3183_p4 = scmp.lt.u32.totalorder %s3174_s8, %s4189_s17 }
 0x14a   : > { %p3177_p8 = pnand %p3175_p6, %p4157_p1  ;;  %p3182_p2 = por %p3181_p12, %p3180_p11 }
 0x14c   : > { %p3178_p7 = pneg %p3177_p8  ;;  %p3184_p10 = por %p3183_p4, %p3182_p2 }
 0x14e   : > { %p3185_p0 = pnand %p3184_p10, %p3178_p7 }
 0x150   : > { %3188 = shalt.err (!%p3185_p0)
}
 0x151   : > { %s3189_s19 = scalar_lea.vmem %s4192_s21, 512  ;;  %s3737_s6 = smov [#allocation8]  }
 0x152   : > { %p3190_p3 = scmp.ne.s32.totalorder %s4192_s21, %s3189_s19  ;;  %s3194_s24 = sshll.u32 %s3737_s6, 4  ;;  %s3195_s24 = int_to_ptr.vmem [resolvable:$false] %s3194_s24 }
 0x153   : > { %s3196_s9 = scalar_lea.vmem %s3195_s24, 1024  ;;  %p3197_p6 = scmp.lt.s32.totalorder %s4192_s21, %s3195_s24 }
 0x154   : > { %p3192_p5 = pnand %p3190_p3, %p4157_p1  ;;  %p3198_p8 = scmp.lt.s32.totalorder %s3196_s9, %s3189_s19 }
 0x156   : > { %p3193_p9 = pneg %p3192_p5  ;;  %p3199_p11 = por %p3198_p8, %p3197_p6 }
 0x158   : > { %p3200_p12 = pnand %p3199_p11, %p3193_p9 }
 0x15a   : > { %3203 = shalt.err (!%p3200_p12)
}
 0x15b   : > { %2775 = dma.hbm_to_vmem [thread:$0]  (!%p4136_p13), %s4189_s17, 512, %s4192_s21, %s4988_s25, %s4989_s11, %s4989_s11, %s4991_s15  }
 0x15c   : > { %s3738_s8 = smov [#allocation16]   ;;  %s3739_s18 = smov [#allocation19]  }
 0x15d   : > { %s672_s2 = sshll.u32 %s3738_s8, 4  ;;  %s696_s6 = sshll.u32 %s3739_s18, 4  ;;  %s673_s2 = int_to_ptr.vmem [resolvable:$true] %s672_s2  ;;  %s697_s6 = int_to_ptr.vmem [resolvable:$true] %s696_s6 }
 0x15e   : > { %s5048_s9 = sld [smem:[#allocation70_spill]]  ;;  %p5049_p2 = scmp.ne.s32.totalorder %s5028_s7, 0 }
 0x164   : > { %s3204_s14 = scalar_lea.hbm %s5048_s9, 128 }
 0x165   : > { %p3205_p7 = scmp.ne.s32.totalorder %s5048_s9, %s3204_s14  ;;  %p3211_p0 = scmp.lt.u32.totalorder %s3204_s14, %s5048_s9 }
 0x167   : > { %p3207_p4 = pnand %p3205_p7, %p5049_p2 }
 0x169   : > { %p3208_p10 = pneg %p3207_p4 }
 0x16b   : > { %p3213_p3 = pnand %p3211_p0, %p3208_p10 }
 0x16d   : > { %3216 = shalt.err (!%p3213_p3)
}
 0x16e   : > { %s3217_s21 = scalar_lea.vmem %s673_s2, 128  ;;  %p3225_p8 = scmp.lt.s32.totalorder %s673_s2, %s673_s2 }
 0x16f   : > { %p3218_p5 = scmp.ne.s32.totalorder %s673_s2, %s3217_s21  ;;  %p3226_p11 = scmp.lt.s32.totalorder %s3217_s21, %s3217_s21 }
 0x171   : > { %p3220_p9 = pnand %p3218_p5, %p5049_p2  ;;  %p3227_p12 = por %p3226_p11, %p3225_p8 }
 0x173   : > { %p3221_p6 = pneg %p3220_p9 }
 0x175   : > { %p3228_p13 = pnand %p3227_p12, %p3221_p6 }
 0x177   : > { %3231 = shalt.err (!%p3228_p13)
}
 0x178   : > { %p5050_p7 = scmp.ne.s32.totalorder %s5026_s3, 0  ;;  %s5051_s28 = smov 4  }
 0x179   : > { %s5052_s30 = smov 64   ;;  %s5053_s10 = sld [smem:[#allocation72_spill]] }
 0x17a   : > { %2723 = dma.hbm_to_vmem [thread:$0]  (!%p5050_p7), %s5048_s9, 128, %s673_s2, [#allocation15], %s5052_s30, %s5052_s30, %s5051_s28  }
 0x17f   : > { %s3232_s8 = scalar_lea.hbm %s5053_s10, 128 }
 0x180   : > { %p3233_p4 = scmp.ne.s32.totalorder %s5053_s10, %s3232_s8  ;;  %p3239_p0 = scmp.lt.u32.totalorder %s3232_s8, %s5053_s10 }
 0x182   : > { %p3235_p13 = pnand %p3233_p4, %p5049_p2 }
 0x184   : > { %p3236_p10 = pneg %p3235_p13 }
 0x186   : > { %p3241_p3 = pnand %p3239_p0, %p3236_p10 }
 0x188   : > { %3244 = shalt.err (!%p3241_p3)
}
 0x189   : > { %s3245_s5 = scalar_lea.vmem %s697_s6, 128  ;;  %p3253_p8 = scmp.lt.s32.totalorder %s697_s6, %s697_s6 }
 0x18a   : > { %p3246_p5 = scmp.ne.s32.totalorder %s697_s6, %s3245_s5  ;;  %p3254_p11 = scmp.lt.s32.totalorder %s3245_s5, %s3245_s5 }
 0x18c   : > { %p3248_p9 = pnand %p3246_p5, %p5049_p2  ;;  %p3255_p12 = por %p3254_p11, %p3253_p8 }
 0x18e   : > { %p3249_p6 = pneg %p3248_p9 }
 0x190   : > { %p3256_p1 = pnand %p3255_p12, %p3249_p6 }
 0x192   : > { %3259 = shalt.err (!%p3256_p1)
}
 0x193   : > { %2729 = dma.hbm_to_vmem [thread:$0]  (!%p5050_p7), %s5053_s10, 128, %s697_s6, [#allocation18], %s5052_s30, %s5052_s30, %s5051_s28  }
 0x194   : > { %s3740_s14 = smov [#allocation22]   ;;  %s3741_s8 = smov [#allocation25]  }
 0x195   : > { %s721_s17 = sshll.u32 %s3740_s14, 4  ;;  %s743_s18 = sshll.u32 %s3741_s8, 4  ;;  %s722_s17 = int_to_ptr.vmem [resolvable:$true] %s721_s17  ;;  %s744_s18 = int_to_ptr.vmem [resolvable:$true] %s743_s18 }
 0x196   : > { %s5054_s12 = sld [smem:[#allocation74_spill]] }
 0x19c   : > { %s3260_s21 = scalar_lea.hbm %s5054_s12, 64 }
 0x19d   : > { %p3261_p1 = scmp.ne.s32.totalorder %s5054_s12, %s3260_s21  ;;  %p3267_p10 = scmp.lt.u32.totalorder %s3260_s21, %s5054_s12 }
 0x19f   : > { %p3263_p4 = pnand %p3261_p1, %p5049_p2 }
 0x1a1   : > { %p3264_p13 = pneg %p3263_p4 }
 0x1a3   : > { %p3269_p0 = pnand %p3267_p10, %p3264_p13 }
 0x1a5   : > { %3272 = shalt.err (!%p3269_p0)
}
 0x1a6   : > { %s3273_s6 = scalar_lea.vmem %s722_s17, 64  ;;  %p3281_p6 = scmp.lt.s32.totalorder %s722_s17, %s722_s17 }
 0x1a7   : > { %p3274_p3 = scmp.ne.s32.totalorder %s722_s17, %s3273_s6  ;;  %p3282_p8 = scmp.lt.s32.totalorder %s3273_s6, %s3273_s6 }
 0x1a9   : > { %p3276_p5 = pnand %p3274_p3, %p5049_p2  ;;  %p3283_p11 = por %p3282_p8, %p3281_p6 }
 0x1ab   : > { %p3277_p9 = pneg %p3276_p5 }
 0x1ad   : > { %p3284_p12 = pnand %p3283_p11, %p3277_p9 }
 0x1af   : > { %3287 = shalt.err (!%p3284_p12)
}
 0x1b0   : > { %2735 = dma.hbm_to_vmem [thread:$0]  (!%p5050_p7), %s5054_s12, 64, %s722_s17, [#allocation21]  }
 0x1b1   : > { %s5055_s8 = sld [smem:[#allocation76_spill]] }
 0x1b7   : > { %s3288_s19 = scalar_lea.hbm %s5055_s8, 64 }
 0x1b8   : > { %p3289_p1 = scmp.ne.s32.totalorder %s5055_s8, %s3288_s19  ;;  %p3295_p10 = scmp.lt.u32.totalorder %s3288_s19, %s5055_s8 }
 0x1ba   : > { %p3291_p4 = pnand %p3289_p1, %p5049_p2 }
 0x1bc   : > { %p3292_p13 = pneg %p3291_p4 }
 0x1be   : > { %p3297_p0 = pnand %p3295_p10, %p3292_p13 }
 0x1c0   : > { %3300 = shalt.err (!%p3297_p0)
}
 0x1c1   : > { %s3301_s6 = scalar_lea.vmem %s744_s18, 64  ;;  %p3309_p6 = scmp.lt.s32.totalorder %s744_s18, %s744_s18 }
 0x1c2   : > { %p3302_p3 = scmp.ne.s32.totalorder %s744_s18, %s3301_s6  ;;  %p3310_p8 = scmp.lt.s32.totalorder %s3301_s6, %s3301_s6 }
 0x1c4   : > { %p3304_p5 = pnand %p3302_p3, %p5049_p2  ;;  %p3311_p11 = por %p3310_p8, %p3309_p6 }
 0x1c6   : > { %p3305_p9 = pneg %p3304_p5 }
 0x1c8   : > { %p3312_p12 = pnand %p3311_p11, %p3305_p9 }
 0x1ca   : > { %3315 = shalt.err (!%p3312_p12)
}
 0x1cb   : > { %2741 = dma.hbm_to_vmem [thread:$0]  (!%p5050_p7), %s5055_s8, 64, %s744_s18, [#allocation24]  }
 0x1cc   : > { %s3742_s1 = smov [#allocation28]   ;;  %s3743_s14 = smov [#allocation31]  }
 0x1cd   : > { %s764_s11 = sshll.u32 %s3742_s1, 4  ;;  %s788_s19 = sshll.u32 %s3743_s14, 4  ;;  %s765_s11 = int_to_ptr.vmem [resolvable:$true] %s764_s11  ;;  %s789_s19 = int_to_ptr.vmem [resolvable:$true] %s788_s19 }
 0x1ce   : > { %s5056_s5 = sld [smem:[#allocation78_spill]] }
 0x1d4   : > { %s5057_s2 = smov %s5056_s5  ;;  %s3316_s15 = scalar_lea.hbm %s5056_s5, 128 }
 0x1d5   : > { %p3317_p1 = scmp.ne.s32.totalorder %s5057_s2, %s3316_s15  ;;  %p3323_p10 = scmp.lt.u32.totalorder %s3316_s15, %s5057_s2 }
 0x1d7   : > { %p3319_p4 = pnand %p3317_p1, %p5049_p2 }
 0x1d9   : > { %p3320_p13 = pneg %p3319_p4 }
 0x1db   : > { %p3325_p0 = pnand %p3323_p10, %p3320_p13 }
 0x1dd   : > { %3328 = shalt.err (!%p3325_p0)
}
 0x1de   : > { %s3329_s18 = scalar_lea.vmem %s765_s11, 128  ;;  %p3337_p6 = scmp.lt.s32.totalorder %s765_s11, %s765_s11 }
 0x1df   : > { %p3330_p3 = scmp.ne.s32.totalorder %s765_s11, %s3329_s18  ;;  %p3338_p8 = scmp.lt.s32.totalorder %s3329_s18, %s3329_s18 }
 0x1e1   : > { %p3332_p5 = pnand %p3330_p3, %p5049_p2  ;;  %p3339_p11 = por %p3338_p8, %p3337_p6 }
 0x1e3   : > { %p3333_p9 = pneg %p3332_p5 }
 0x1e5   : > { %p3340_p12 = pnand %p3339_p11, %p3333_p9 }
 0x1e7   : > { %3343 = shalt.err (!%p3340_p12)
}
 0x1e8   : > { %2747 = dma.hbm_to_vmem [thread:$0]  (!%p5050_p7), %s5057_s2, 128, %s765_s11, [#allocation27], %s5052_s30, %s5052_s30, %s5051_s28  }
 0x1e9   : > { %s5058_s1 = sld [smem:[#allocation80_spill]] }
 0x1ef   : > { %s3344_s14 = scalar_lea.hbm %s5058_s1, 128 }
 0x1f0   : > { %p3345_p1 = scmp.ne.s32.totalorder %s5058_s1, %s3344_s14  ;;  %p3351_p10 = scmp.lt.u32.totalorder %s3344_s14, %s5058_s1 }
 0x1f2   : > { %p3347_p4 = pnand %p3345_p1, %p5049_p2 }
 0x1f4   : > { %p3348_p13 = pneg %p3347_p4 }
 0x1f6   : > { %p3353_p0 = pnand %p3351_p10, %p3348_p13 }
 0x1f8   : > { %3356 = shalt.err (!%p3353_p0)
}
 0x1f9   : > { %s3357_s17 = scalar_lea.vmem %s789_s19, 128  ;;  %p3365_p6 = scmp.lt.s32.totalorder %s789_s19, %s789_s19 }
 0x1fa   : > { %p3358_p3 = scmp.ne.s32.totalorder %s789_s19, %s3357_s17  ;;  %p3366_p8 = scmp.lt.s32.totalorder %s3357_s17, %s3357_s17 }
 0x1fc   : > { %p3360_p5 = pnand %p3358_p3, %p5049_p2  ;;  %p3367_p11 = por %p3366_p8, %p3365_p6 }
 0x1fe   : > { %p3361_p9 = pneg %p3360_p5 }
 0x200   : > { %p3368_p12 = pnand %p3367_p11, %p3361_p9 }
 0x202   : > { %3371 = shalt.err (!%p3368_p12)
}
 0x203   : > { %2753 = dma.hbm_to_vmem [thread:$0]  (!%p5050_p7), %s5058_s1, 128, %s789_s19, [#allocation30], %s5052_s30, %s5052_s30, %s5051_s28  }
 0x204   : > { %s3744_s10 = smov [#allocation34]   ;;  %s3745_s9 = smov [#allocation35]  }
 0x205   : > { %s812_s15 = sshll.u32 %s3744_s10, 4  ;;  %s826_s25 = sshll.u32 %s3745_s9, 4  ;;  %s813_s15 = int_to_ptr.vmem [resolvable:$true] %s812_s15  ;;  %s827_s25 = int_to_ptr.vmem [resolvable:$true] %s826_s25 }
 0x206   : > { %s5059_s21 = sld [smem:[#allocation82_spill]] }
 0x20c   : > { %s3372_s5 = scalar_lea.hbm %s5059_s21, 256 }
 0x20d   : > { %p3373_p1 = scmp.ne.s32.totalorder %s5059_s21, %s3372_s5  ;;  %p3379_p10 = scmp.lt.u32.totalorder %s3372_s5, %s5059_s21 }
 0x20f   : > { %p3375_p4 = pnand %p3373_p1, %p5049_p2 }
 0x211   : > { %p3376_p13 = pneg %p3375_p4 }
 0x213   : > { %p3381_p0 = pnand %p3379_p10, %p3376_p13 }
 0x215   : > { %3384 = shalt.err (!%p3381_p0)
}
 0x216   : > { %s3385_s19 = scalar_lea.vmem %s813_s15, 256  ;;  %p3393_p6 = scmp.lt.s32.totalorder %s813_s15, %s813_s15 }
 0x217   : > { %p3386_p3 = scmp.ne.s32.totalorder %s813_s15, %s3385_s19  ;;  %p3394_p8 = scmp.lt.s32.totalorder %s3385_s19, %s3385_s19 }
 0x219   : > { %p3388_p5 = pnand %p3386_p3, %p5049_p2  ;;  %p3395_p11 = por %p3394_p8, %p3393_p6 }
 0x21b   : > { %p3389_p9 = pneg %p3388_p5 }
 0x21d   : > { %p3396_p12 = pnand %p3395_p11, %p3389_p9 }
 0x21f   : > { %3399 = shalt.err (!%p3396_p12)
}
 0x220   : > { %2759 = dma.hbm_to_vmem [thread:$0]  (!%p5050_p7), %s5059_s21, 256, %s813_s15, [#allocation33], %s5052_s30, %s5052_s30, %s5051_s28  }
 0x221   : > { %s5060_s14 = sld [smem:[#allocation83_spill]] }
 0x227   : > { %s3400_s24 = scalar_lea.hbm %s5060_s14, 16 }
 0x228   : > { %p3401_p1 = scmp.ne.s32.totalorder %s5060_s14, %s3400_s24  ;;  %p3407_p10 = scmp.lt.u32.totalorder %s3400_s24, %s5060_s14 }
 0x22a   : > { %p3403_p4 = pnand %p3401_p1, %p5049_p2 }
 0x22c   : > { %p3404_p13 = pneg %p3403_p4 }
 0x22e   : > { %p3409_p0 = pnand %p3407_p10, %p3404_p13 }
 0x230   : > { %3412 = shalt.err (!%p3409_p0)
}
 0x231   : > { %s3413_s19 = scalar_lea.vmem %s827_s25, 16  ;;  %s3420_s28 = scalar_lea.vmem %s827_s25, 32 }
 0x232   : > { %p3414_p3 = scmp.ne.s32.totalorder %s827_s25, %s3413_s19  ;;  %p3421_p6 = scmp.lt.s32.totalorder %s827_s25, %s827_s25 }
 0x233   : > { %p3422_p8 = scmp.lt.s32.totalorder %s3420_s28, %s3413_s19 }
 0x234   : > { %p3416_p5 = pnand %p3414_p3, %p5049_p2 }
 0x235   : > { %p3423_p11 = por %p3422_p8, %p3421_p6 }
 0x236   : > { %p3417_p9 = pneg %p3416_p5 }
 0x238   : > { %p3424_p12 = pnand %p3423_p11, %p3417_p9 }
 0x23a   : > { %3427 = shalt.err (!%p3424_p12)
}
 0x23b   : > { %2762 = dma.hbm_to_vmem [thread:$0]  (!%p5050_p7), %s5060_s14, 16, %s827_s25, [#allocation36]  }
 0x23c   : > { %s5061_s18 = sld [smem:[#allocation62_spill]]  ;;  %s841_s9 = scalar_lea.vmem [#allocation2], %s4131_s22 }
 0x23d   : > { %s848_s3 = sshll.u32 %s841_s9, 4  ;;  %s5062_s6 = sld [smem:[#allocation64_spill]]  ;;  %s4387_s3 = int_to_ptr.vmem [resolvable:$true] %s848_s3 }
 0x23e   : > { %s5063_s11 = sand.u32 1, %s3718_s27   ;;  %p5064_p7 = scmp.ne.s32.totalorder %s5045_s13, 0 }
 0x23f   : > { %s4397_s25 = scalar_lea.sflag [#allocation3], %s5063_s11 }
 0x242   : > { %s4384_s10 = scalar_lea.hbm %s5061_s18, %s4134_s23  ;;  %s3433_s15 = scalar_lea.hbm %s5061_s18, 1024 }
 0x243   : > { %s4393_s17 = scalar_lea.hbm %s5062_s6, %s4134_s23  ;;  %s3428_s19 = scalar_lea.hbm %s4384_s10, 512 }
 0x244   : > { %p3429_p2 = scmp.ne.s32.totalorder %s4384_s10, %s3428_s19  ;;  %p3434_p13 = scmp.lt.u32.totalorder %s4384_s10, %s5061_s18 }
 0x245   : > { %p3435_p10 = scmp.lt.u32.totalorder %s3433_s15, %s3428_s19  ;;  %p3437_p3 = scmp.lt.u32.totalorder %s3428_s19, %s4384_s10 }
 0x246   : > { %p3431_p1 = pnand %p3429_p2, %p5064_p7 }
 0x247   : > { %p3436_p0 = por %p3435_p10, %p3434_p13 }
 0x248   : > { %p3432_p4 = pneg %p3431_p1 }
 0x249   : > { %p3438_p5 = por %p3437_p3, %p3436_p0 }
 0x24b   : > { %p3439_p9 = pnand %p3438_p5, %p3432_p4 }
 0x24d   : > { %3442 = shalt.err (!%p3439_p9)
}
 0x24e   : > { %s3443_s9 = scalar_lea.vmem %s4387_s3, 512  ;;  %s3746_s24 = smov [#allocation2]  }
 0x24f   : > { %p3444_p6 = scmp.ne.s32.totalorder %s4387_s3, %s3443_s9  ;;  %s3448_s5 = sshll.u32 %s3746_s24, 4  ;;  %s3449_s5 = int_to_ptr.vmem [resolvable:$false] %s3448_s5 }
 0x250   : > { %s3450_s11 = scalar_lea.vmem %s3449_s5, 1024  ;;  %p3451_p12 = scmp.lt.s32.totalorder %s4387_s3, %s3449_s5 }
 0x251   : > { %p3446_p8 = pnand %p3444_p6, %p5064_p7  ;;  %p3452_p2 = scmp.lt.s32.totalorder %s3450_s11, %s3443_s9 }
 0x253   : > { %p3447_p11 = pneg %p3446_p8  ;;  %p3453_p1 = por %p3452_p2, %p3451_p12 }
 0x255   : > { %p3454_p13 = pnand %p3453_p1, %p3447_p11 }
 0x257   : > { %3457 = shalt.err (!%p3454_p13)
}
 0x258   : > { %p5065_p4 = scmp.ne.s32.totalorder %s5043_s20, 0  ;;  %s5066_s19 = smov 8  }
 0x259   : > { %s5067_s28 = smov 128   ;;  %s883_s30 = scalar_lea.vmem [#allocation7], %s4131_s22 }
 0x25a   : > { %2766 = dma.hbm_to_vmem [thread:$0]  (!%p5065_p4), %s4384_s10, 512, %s4387_s3, %s4397_s25, %s5067_s28, %s5067_s28, %s5066_s19  }
 0x25b   : > { %s890_s15 = sshll.u32 %s883_s30, 4  ;;  %s5068_s9 = sld [smem:[#allocation66_spill]]  ;;  %s4425_s15 = int_to_ptr.vmem [resolvable:$true] %s890_s15 }
 0x25c   : > { %s3458_s5 = scalar_lea.hbm %s4393_s17, 512  ;;  %s3463_s8 = scalar_lea.hbm %s5062_s6, 1024 }
 0x25d   : > { %p3459_p10 = scmp.ne.s32.totalorder %s4393_s17, %s3458_s5  ;;  %p3464_p5 = scmp.lt.u32.totalorder %s4393_s17, %s5062_s6 }
 0x25e   : > { %p3465_p9 = scmp.lt.u32.totalorder %s3463_s8, %s3458_s5  ;;  %p3467_p8 = scmp.lt.u32.totalorder %s3458_s5, %s4393_s17 }
 0x25f   : > { %p3461_p0 = pnand %p3459_p10, %p5064_p7 }
 0x260   : > { %p3466_p6 = por %p3465_p9, %p3464_p5 }
 0x261   : > { %s4431_s24 = scalar_lea.hbm %s5068_s9, %s4134_s23  ;;  %p3462_p3 = pneg %p3461_p0 }
 0x262   : > { %p3468_p11 = por %p3467_p8, %p3466_p6 }
 0x264   : > { %p3469_p12 = pnand %p3468_p11, %p3462_p3 }
 0x266   : > { %3472 = shalt.err (!%p3469_p12)
}
 0x267   : > { %s3473_s3 = scalar_lea.vmem %s4425_s15, 512  ;;  %s3747_s1 = smov [#allocation7]  }
 0x268   : > { %p3474_p2 = scmp.ne.s32.totalorder %s4425_s15, %s3473_s3  ;;  %s3478_s25 = sshll.u32 %s3747_s1, 4  ;;  %s3479_s25 = int_to_ptr.vmem [resolvable:$false] %s3478_s25 }
 0x269   : > { %s3480_s12 = scalar_lea.vmem %s3479_s25, 1024  ;;  %p3481_p10 = scmp.lt.s32.totalorder %s4425_s15, %s3479_s25 }
 0x26a   : > { %p3476_p1 = pnand %p3474_p2, %p5064_p7  ;;  %p3482_p0 = scmp.lt.s32.totalorder %s3480_s12, %s3473_s3 }
 0x26c   : > { %p3477_p13 = pneg %p3476_p1  ;;  %p3483_p5 = por %p3482_p0, %p3481_p10 }
 0x26e   : > { %p3484_p9 = pnand %p3483_p5, %p3477_p13 }
 0x270   : > { %3487 = shalt.err (!%p3484_p9)
}
 0x271   : > { %s5069_s8 = scalar_lea.sflag [#allocation6], %s4141_s4  ;;  %s925_s30 = scalar_lea.vmem [#allocation10], %s4131_s22 }
 0x272   : > { %2772 = dma.hbm_to_vmem [thread:$0]  (!%p5065_p4), %s4393_s17, 512, %s4425_s15, %s5069_s8, %s5067_s28, %s5067_s28, %s5066_s19  }
 0x273   : > { %s932_s7 = sshll.u32 %s925_s30, 4  ;;  %s3488_s2 = scalar_lea.hbm %s4431_s24, 512  ;;  %s4460_s7 = int_to_ptr.vmem [resolvable:$true] %s932_s7 }
 0x274   : > { %p3489_p3 = scmp.ne.s32.totalorder %s4431_s24, %s3488_s2  ;;  %s3493_s10 = scalar_lea.hbm %s5068_s9, 1024 }
 0x275   : > { %p3494_p11 = scmp.lt.u32.totalorder %s4431_s24, %s5068_s9  ;;  %p3495_p12 = scmp.lt.u32.totalorder %s3493_s10, %s3488_s2 }
 0x276   : > { %p3491_p6 = pnand %p3489_p3, %p5064_p7  ;;  %p3497_p1 = scmp.lt.u32.totalorder %s3488_s2, %s4431_s24 }
 0x277   : > { %p3496_p2 = por %p3495_p12, %p3494_p11 }
 0x278   : > { %p3492_p8 = pneg %p3491_p6 }
 0x279   : > { %p3498_p13 = por %p3497_p1, %p3496_p2 }
 0x27b   : > { %p3499_p10 = pnand %p3498_p13, %p3492_p8 }
 0x27d   : > { %3502 = shalt.err (!%p3499_p10)
}
 0x27e   : > { %s3503_s17 = scalar_lea.vmem %s4460_s7, 512  ;;  %s3748_s15 = smov [#allocation10]  }
 0x27f   : > { %p3504_p0 = scmp.ne.s32.totalorder %s4460_s7, %s3503_s17  ;;  %s3508_s25 = sshll.u32 %s3748_s15, 4  ;;  %s3509_s25 = int_to_ptr.vmem [resolvable:$false] %s3508_s25 }
 0x280   : > { %s3510_s12 = scalar_lea.vmem %s3509_s25, 1024  ;;  %p3511_p3 = scmp.lt.s32.totalorder %s4460_s7, %s3509_s25 }
 0x281   : > { %p3506_p5 = pnand %p3504_p0, %p5064_p7  ;;  %p3512_p6 = scmp.lt.s32.totalorder %s3510_s12, %s3503_s17 }
 0x283   : > { %p3507_p9 = pneg %p3506_p5  ;;  %p3513_p11 = por %p3512_p6, %p3511_p3 }
 0x285   : > { %p3514_p12 = pnand %p3513_p11, %p3507_p9 }
 0x287   : > { %3517 = shalt.err (!%p3514_p12)
}
 0x288   : > { %s5070_s8 = scalar_lea.sflag [#allocation9], %s4141_s4  ;;  %s5071_s5 = sld [smem:[#allocation67_spill]] }
 0x289   : > { %2778 = dma.hbm_to_vmem [thread:$0]  (!%p5065_p4), %s4431_s24, 512, %s4460_s7, %s5070_s8, %s5067_s28, %s5067_s28, %s5066_s19  }
 0x28a   : > { %s946_s3 = scalar_lea.vmem [#allocation11], %s4131_s22  ;;  %s943_s17 = scalar_lea.sflag [#allocation12], %s4141_s4 }
 0x28b   : > { %s953_s1 = sshll.u32 %s946_s3, 4  ;;  %s4495_s1 = int_to_ptr.vmem [resolvable:$true] %s953_s1 }
 0x28e   : > { %s5072_s11 = smov %s5071_s5  ;;  %s4492_s10 = scalar_lea.hbm %s5071_s5, %s4134_s23 }
 0x28f   : > { %s3518_s15 = scalar_lea.hbm %s4492_s10, 512  ;;  %s3523_s25 = scalar_lea.hbm %s5072_s11, 1024 }
 0x290   : > { %p3519_p8 = scmp.ne.s32.totalorder %s4492_s10, %s3518_s15  ;;  %p3524_p13 = scmp.lt.u32.totalorder %s4492_s10, %s5072_s11 }
 0x291   : > { %p3525_p10 = scmp.lt.u32.totalorder %s3523_s25, %s3518_s15  ;;  %p3527_p5 = scmp.lt.u32.totalorder %s3518_s15, %s4492_s10 }
 0x292   : > { %p3521_p2 = pnand %p3519_p8, %p5064_p7 }
 0x293   : > { %p3526_p0 = por %p3525_p10, %p3524_p13 }
 0x294   : > { %p3522_p1 = pneg %p3521_p2 }
 0x295   : > { %p3528_p9 = por %p3527_p5, %p3526_p0 }
 0x297   : > { %p3529_p3 = pnand %p3528_p9, %p3522_p1 }
 0x299   : > { %3532 = shalt.err (!%p3529_p3)
}
 0x29a   : > { %s3533_s22 = scalar_lea.vmem %s4495_s1, 512  ;;  %s3749_s8 = smov [#allocation11]  }
 0x29b   : > { %p3534_p6 = scmp.ne.s32.totalorder %s4495_s1, %s3533_s22  ;;  %s3538_s30 = sshll.u32 %s3749_s8, 4  ;;  %s3539_s30 = int_to_ptr.vmem [resolvable:$false] %s3538_s30 }
 0x29c   : > { %s3540_s2 = scalar_lea.vmem %s3539_s30, 1024  ;;  %p3541_p8 = scmp.lt.s32.totalorder %s4495_s1, %s3539_s30 }
 0x29d   : > { %p3536_p11 = pnand %p3534_p6, %p5064_p7  ;;  %p3542_p2 = scmp.lt.s32.totalorder %s3540_s2, %s3533_s22 }
 0x29f   : > { %p3537_p12 = pneg %p3536_p11  ;;  %p3543_p13 = por %p3542_p2, %p3541_p8 }
 0x2a1   : > { %p3544_p10 = pnand %p3543_p13, %p3537_p12 }
 0x2a3   : > { %3547 = shalt.err (!%p3544_p10)
}
 0x2a4   : > { %2781 = dma.hbm_to_vmem [thread:$0]  (!%p5065_p4), %s4492_s10, 512, %s4495_s1, %s943_s17, %s5067_s28, %s5067_s28, %s5066_s19  }
 0x2a5   : > { %s5073_s13 = sld [smem:[#allocation58_spill]] }
 0x2ab   : > { %p5074_p7 = scmp.ne.s32.totalorder %s5073_s13, 0 }
 0x2ac   : > { %s4527_s5 = sand.u32 (!%p5074_p7), 1, %s3714_s26   ;;  %p5075_p1 = scmp.ne.s32.totalorder (!%p5074_p7), %s5039_s0, 0 }
 0x2ad   : > { %965 = sbr.rel (%p5074_p7) target bundleno = 2163 (0x873), region = 108  ;;  %s4530_s3 = sshll.u32 (!%p5074_p7), %s4527_s5, 5 }
 0x2ae   : > { %s968_s20 = scalar_lea.sflag (!%p5074_p7), [#allocation3], %s4527_s5  ;;  %s4534_s15 = scalar_lea.vmem (!%p5074_p7), [#allocation2], %s4530_s3 }
 0x2b4   : > { %3649 = dma.done.wait (%p5075_p1), %s968_s20, 512  }
 0x2b5   : > { %3651 = vsyncadd (%p5075_p1), %s968_s20, 4294966784  ;;  %s4541_s4 = sand.u32 1, %s3901_s29   ;;  %s4545_s28 = scalar_lea.vmem [#allocation5], %s4530_s3 }
 0x2b6   : > { %s977_s19 = scalar_lea.sflag [#allocation6], %s4541_s4 }
 0x2b7   : > { %3653 = dma.done.wait (%p5075_p1), %s977_s19, 1024  }
 0x2b8   : > { %3655 = vsyncadd (%p5075_p1), %s977_s19, 4294966272  ;;  %s4552_s10 = scalar_lea.vmem [#allocation7], %s4530_s3  ;;  %s995_s1 = scalar_lea.sflag [#allocation9], %s4541_s4 }
 0x2b9   : > { %s4556_s17 = scalar_lea.vmem [#allocation8], %s4530_s3 }
 0x2ba   : > { %3657 = dma.done.wait (%p5075_p1), %s995_s1, 1024  }
 0x2bb   : > { %3659 = vsyncadd (%p5075_p1), %s995_s1, 4294966272  ;;  %s4563_s24 = scalar_lea.vmem [#allocation10], %s4530_s3  ;;  %s1013_s7 = scalar_lea.sflag [#allocation12], %s4541_s4 }
 0x2bc   : > { %s4567_s25 = scalar_lea.vmem [#allocation11], %s4530_s3 }
 0x2bd   : > { %3661 = dma.done.wait (%p5075_p1), %s1013_s7, 512  }
 0x2be   : > { %3663 = vsyncadd (%p5075_p1), %s1013_s7, 4294966784  ;;  %p5076_p4 = scmp.eq.s32.totalorder %s3901_s29, 0 }
 0x2c0   : > { %3665 = dma.done.wait (%p5076_p4), [#allocation12], 256   ;;  %p5077_p0 = pmov %p5076_p4 }
 0x2c2   : > { %3667 = vsyncadd (%p5077_p0), [#allocation12], 4294967040  ;;  %p5078_p5 = pmov %p5077_p0 }
 0x2c3   : > { %p5079_p9 = pmov %p5077_p0 }
 0x2c4   : > { %3669 = dma.done.wait (%p5078_p5), [#allocation15], 144  }
 0x2c5   : > { %3671 = vsyncadd (%p5079_p9), [#allocation15], 4294967152  ;;  %p5080_p3 = pmov %p5077_p0 }
 0x2c6   : > { %p5081_p6 = pmov %p5077_p0 }
 0x2c7   : > { %3673 = dma.done.wait (%p5080_p3), [#allocation18], 144  }
 0x2c8   : > { %3675 = vsyncadd (%p5081_p6), [#allocation18], 4294967152  ;;  %p5082_p11 = pmov %p5077_p0 }
 0x2c9   : > { %p5083_p12 = pmov %p5077_p0 }
 0x2ca   : > { %3677 = dma.done.wait (%p5082_p11), [#allocation21], 80  }
 0x2cb   : > { %3679 = vsyncadd (%p5083_p12), [#allocation21], 4294967216  ;;  %p5084_p8 = pmov %p5077_p0 }
 0x2cc   : > { %p5085_p2 = pmov %p5077_p0 }
 0x2cd   : > { %3681 = dma.done.wait (%p5084_p8), [#allocation24], 80  }
 0x2ce   : > { %3683 = vsyncadd (%p5085_p2), [#allocation24], 4294967216  ;;  %p5086_p13 = pmov %p5077_p0 }
 0x2cf   : > { %p5087_p10 = pmov %p5077_p0 }
 0x2d0   : > { %3685 = dma.done.wait (%p5086_p13), [#allocation27], 144  }
 0x2d1   : > { %3687 = vsyncadd (%p5087_p10), [#allocation27], 4294967152  ;;  %p5088_p7 = pmov %p5077_p0 }
 0x2d2   : > { %p5089_p1 = pmov %p5077_p0 }
 0x2d3   : > { %3689 = dma.done.wait (%p5088_p7), [#allocation30], 144  }
 0x2d4   : > { %3691 = vsyncadd (%p5089_p1), [#allocation30], 4294967152  ;;  %p5090_p4 = pmov %p5077_p0 }
 0x2d6   : > { %3693 = dma.done.wait (%p5090_p4), [#allocation33], 272  }
 0x2d7   : > { %3695 = vsyncadd (%p5077_p0), [#allocation33], 4294967024  ;;  %p5091_p5 = pmov %p5077_p0 }
 0x2d8   : > { %p5092_p9 = pmov %p5077_p0 }
 0x2d9   : > { %3697 = dma.done.wait (%p5091_p5), [#allocation36], 16  }
 0x2da   : > { %3699 = vsyncadd (%p5092_p9), [#allocation36], 4294967280  ;;  %vm1218_vm0 = vcmask 1043456   ;;  %v1198_v0 = vld [vmem:[#allocation25] sm:$0xf]  ;;  %v4610_v1 = vld [vmem:[%s4556_s17] sm:$0xff] }
 0x2db   : > { %v4613_v2 = vld [vmem:[%s4556_s17 + $0x8] sm:$0xff]  ;;  %vm1211_vm1 = vcmask 64512   ;;  %2630 = vmatprep.subr.msk.bf16.mxu0 %vm1218_vm0, %v1198_v0  ;;  %v1220_v3 = vsel %vm1218_vm0, %v1198_v0, 0  ;;  %v4620_v5 = vld [vmem:[%s4556_s17 + $0x10] sm:$0xff]  ;;  %v4623_v6 = vld [vmem:[%s4556_s17 + $0x18] sm:$0xff]  ;;  %vm1321_vm2 = vcmask 130048  }
 0x2dc   : > { %v1203_v4 = vpack.c.bf16 %v4613_v2, %v4610_v1  ;;  %2579 = vmatpush3.bf16.msra.mxu0 %v1220_v3  ;;  %v1204_v7 = vpack.c.bf16 %v4623_v6, %v4620_v5  ;;  %v2880_v8 = vld [vmem:[#allocation28] sm:$0xff]   ;;  %v2500_v9 = vld [vmem:[#allocation26] ss:$0 sm:$0xff]  ;;  %v2881_v56 = vld [vmem:[#allocation31] sm:$0xff]   ;;  %vm1518_vm3 = vcmask 261120   ;;  %s4738_s0 = scalar_lea.vmem [#allocation37], %s4530_s3 }
 0x2dd   : > { %2584 = vmatprep.subr.bf16.mxu1 %v2880_v8  ;;  %2590 = vmatprep.subr.bf16.mxu0 %v2881_v56  ;;  %v2882_v57 = vld [vmem:[#allocation13] sm:$0xff]   ;;  %v2503_v58 = vld [vmem:[#allocation29] ss:$0 sm:$0xff]  ;;  %s4757_s23 = scalar_lea.vmem [#allocation38], %s4530_s3  ;;  %s4776_s12 = sshll.u32 %s3901_s29, 9 }
 0x2de   : > { %2580 = vmatprep.mubr.msk.bf16.mxu0 %vm1211_vm1, %v1203_v4  ;;  %2585 = vmatpush3.bf16.msra.mxu1 %v2880_v8  ;;  %v1197_v62 = vld [vmem:[%s4563_s24 + $0x18] sm:$0xff]  ;;  %v1194_v3 = vld [vmem:[%s4563_s24] sm:$0xff]  ;;  %s5093_s30 = sld [smem:[#allocation85_spill]]  ;;  %s2026_s13 = sshll.u32 %s4757_s23, 4  ;;  %s4785_s13 = int_to_ptr.vmem [resolvable:$true] %s2026_s13 }
 0x2df   : > { %2581 = vmatmul.mubr.msk.bf16.vlgmr.msra.gmra.mrb[0].mxu0 %vm1211_vm1, %v1204_v7  ;;  %v1195_v7 = vld [vmem:[%s4563_s24 + $0x8] sm:$0xff]  ;;  %s1992_s20 = scalar_lea.sflag [#allocation39], %s4541_s4  ;;  %p5094_p6 = scmp.ne.s32.totalorder %s5040_s16, 0 }
 0x2e0   : > { %2591 = vmatpush3.bf16.msra.mxu0 %v2881_v56  ;;  %s3750_s29 = smov [#allocation38]  }
 0x2e1   : > { %2604 = vmatprep.subr.bf16.mxu0 %v2882_v57  ;;  %s3552_s19 = sshll.u32 %s3750_s29, 4  ;;  %s3553_s19 = int_to_ptr.vmem [resolvable:$false] %s3552_s19 }
 0x2e2   : > { %p3555_p8 = scmp.lt.s32.totalorder %s4785_s13, %s3553_s19 }
 0x2e4   : > { %s4782_s2 = scalar_lea.hbm %s5093_s30, %s4776_s12 }
 0x3b2   : > { %v2582_v10 = vpop.f32.mrb[0].mxu0 }
 0x3b3   : > { %v1265_v11 = vadd.f32 %v2582_v10, %v2500_v9  ;;  %v1256_v12 = vpop.f32.mrb[1].mxu0 }
 0x3b4   : > { %v1257_v13 = vadd.f32 %v2500_v9, %v1256_v12  ;;  %v2583_v14 = vpop.f32.mrb[2].mxu0  ;;  %v4638_v12 = vld [vmem:[%s4534_s15] sm:$0xff] }
 0x3b5   : > { %v1273_v15 = vmul.f32 %v1265_v11, %v1265_v11  ;;  %v1268_v16 = vadd.f32 %v2583_v14, %v2500_v9  ;;  %v1259_v17 = vpop.f32.mrb[3].mxu0 }
 0x3b6   : > { %v1271_v18 = vmul.f32 %v1257_v13, %v1257_v13  ;;  %v1260_v19 = vadd.f32 %v2500_v9, %v1259_v17  ;;  %v1196_v9 = vld [vmem:[%s4563_s24 + $0x10] sm:$0xff] }
 0x3b7   : > { %v1277_v20 = vmul.f32 %v1273_v15, %v1265_v11  ;;  %v1274_v21 = vmul.f32 %v1268_v16, %v1268_v16 }
 0x3b8   : > { %v1275_v22 = vmul.f32 %v1271_v18, %v1257_v13  ;;  %v1272_v23 = vmul.f32 %v1260_v19, %v1260_v19 }
 0x3b9   : > { %v1281_v24 = vmul.f32 0.044715, %v1277_v20  ;;  %v1278_v25 = vmul.f32 %v1274_v21, %v1268_v16  ;;  %v2883_v20 = vld [vmem:[#allocation13 + $0x8] sm:$0xff]   ;;  %v4659_v21 = vld [vmem:[%s4534_s15 + $0x10] sm:$0xff] }
 0x3ba   : > { %v1279_v26 = vmul.f32 0.044715, %v1275_v22  ;;  %v1276_v27 = vmul.f32 %v1272_v23, %v1260_v19  ;;  %v4662_v22 = vld [vmem:[%s4534_s15 + $0x18] sm:$0xff] }
 0x3bb   : > { %v1285_v28 = vadd.f32 %v1281_v24, %v1265_v11  ;;  %v1282_v29 = vmul.f32 0.044715, %v1278_v25  ;;  %v1603_v23 = vpack.c.bf16 %v4662_v22, %v4659_v21  ;;  %v2884_v24 = vld [vmem:[#allocation34] sm:$0xff]   ;;  %v2885_v25 = vld [vmem:[#allocation34 + $0x8] sm:$0xff]  }
 0x3bc   : > { %v1283_v30 = vadd.f32 %v1279_v26, %v1257_v13  ;;  %v1280_v31 = vmul.f32 0.044715, %v1276_v27  ;;  %2596 = vmatprep.subr.bf16.mxu1 %v2884_v24  ;;  %v4667_v26 = vld [vmem:[#allocation16] sm:$0xff]   ;;  %v2507_v27 = vld [vmem:[#allocation32] ss:$0 sm:$0xff] }
 0x3bd   : > { %v1289_v32 = vmul.f32 0.7978846, %v1285_v28  ;;  %v1286_v33 = vadd.f32 %v1282_v29, %v1268_v16 }
 0x3be   : > { %v1287_v34 = vmul.f32 0.7978846, %v1283_v30  ;;  %v1284_v35 = vadd.f32 %v1280_v31, %v1260_v19 }
 0x3bf   : > { %2888 = vtanh.f32 %v1289_v32  ;;  %v1290_v36 = vmul.f32 0.7978846, %v1286_v33 }
 0x3c0   : > { %v1288_v37 = vmul.f32 0.7978846, %v1284_v35  ;;  %2890 = vtanh.f32 %v1287_v34 }
 0x3c1   : > { %2892 = vtanh.f32 %v1290_v36 }
 0x3c2   : > { %2894 = vtanh.f32 %v1288_v37 }
 0x3c9   : > { %v2889_v38 = vpop.eup %2888 }
 0x3ca   : > { %v2891_v39 = vpop.eup %2890  ;;  %v1297_v40 = vadd.f32 1.0, %v2889_v38 }
 0x3cb   : > { %v2893_v41 = vpop.eup %2892  ;;  %v1295_v42 = vadd.f32 1.0, %v2891_v39 }
 0x3cc   : > { %v2895_v43 = vpop.eup %2894  ;;  %v1301_v44 = vmul.f32 0.5, %v1297_v40  ;;  %v1298_v45 = vadd.f32 1.0, %v2893_v41 }
 0x3cd   : > { %v1296_v46 = vadd.f32 1.0, %v2895_v43  ;;  %v1299_v47 = vmul.f32 0.5, %v1295_v42  ;;  %v2516_v42 = vld [vmem:[#allocation14] ss:$0 sm:$0xff] }
 0x3ce   : > { %v1302_v48 = vmul.f32 0.5, %v1298_v45  ;;  %v1305_v50 = vmul.f32 %v1301_v44, %v1265_v11 }
 0x3cf   : > { %v1300_v49 = vmul.f32 0.5, %v1296_v46  ;;  %v1303_v52 = vmul.f32 %v1299_v47, %v1257_v13  ;;  %v4641_v13 = vld [vmem:[%s4534_s15 + $0x8] sm:$0xff]  ;;  %s3548_s15 = scalar_lea.vmem %s4785_s13, 512 }
 0x3d0   : > { %v1306_v51 = vmul.f32 %v1302_v48, %v1268_v16  ;;  %v1602_v18 = vpack.c.bf16 %v4641_v13, %v4638_v12  ;;  %p3549_p3 = scmp.ne.s32.totalorder %s4785_s13, %s3548_s15 }
 0x3d1   : > { %v1304_v53 = vmul.f32 %v1300_v49, %v1260_v19 }
 0x3d2   : > { %v1308_v54 = vpack.c.bf16 %v1306_v51, %v1305_v50  ;;  %p3550_p11 = pnand %p3549_p3, %p5094_p6 }
 0x3d3   : > { %v1307_v55 = vpack.c.bf16 %v1304_v53, %v1303_v52 }
 0x3d4   : > { %p3551_p12 = pneg %p3550_p11 }
 0x3d5   : > { %2586 = vmatprep.mubr.msk.bf16.mxu1 %vm1321_vm2, %v1307_v55 }
 0x3d6   : > { %2587 = vmatmul.mubr.msk.bf16.vlgmr.msra.gmra.mrb[0].mxu1 %vm1321_vm2, %v1308_v54 }
 0x3d7   : > { %2597 = vmatpush3.bf16.msra.mxu1 %v2884_v24 }
 0x3d8   : > { %2598 = vmatprep.subr.bf16.mxu1 %v2885_v25 }
 0x3db   : > { %2599 = vmatpush3.bf16.msra.mxu1 %v2885_v25 }
 0x3dc   : > { %2612 = vmatprep.subr.bf16.mxu1 %v4667_v26 }
 0x4a9   : > { %v2588_v59 = vpop.f32.mrb[0].mxu1 }
 0x4aa   : > { %v1362_v60 = vpop.f32.mrb[1].mxu1  ;;  %v1371_v0 = vadd.f32 %v2588_v59, %v2503_v58 }
 0x4ab   : > { %v1363_v61 = vadd.f32 %v2503_v58, %v1362_v60  ;;  %v2589_v63 = vpop.f32.mrb[2].mxu1 }
 0x4ac   : > { %v1374_v4 = vadd.f32 %v2589_v63, %v2503_v58  ;;  %v1365_v8 = vpop.f32.mrb[3].mxu1  ;;  %v4647_v16 = vadd.f32 %v1371_v0, %v1196_v9 }
 0x4ad   : > { %v1366_v10 = vadd.f32 %v2503_v58, %v1365_v8  ;;  %v4643_v14 = vadd.f32 %v1363_v61, %v1194_v3 }
 0x4ae   : > { %v4635_v11 = vadd.f32 %v1374_v4, %v1197_v62 }
 0x4af   : > { %v4645_v15 = vadd.f32 %v1366_v10, %v1195_v7 }
 0x4b0   : > { %v1394_v19 = vpack.c.bf16 %v4635_v11, %v4647_v16 }
 0x4b1   : > { %v1393_v17 = vpack.c.bf16 %v4645_v15, %v4643_v14 }
 0x4b3   : > { %2592 = vmatprep.mubr.msk.bf16.mxu0 %vm1321_vm2, %v1393_v17 }
 0x4b4   : > { %2593 = vmatmul.mubr.msk.bf16.vlgmr.msra.gmra.mrb[4].mxu0 %vm1321_vm2, %v1394_v19 }
 0x4b5   : > { %2605 = vmatpush3.bf16.msra.mxu0 %v2882_v57  ;;  %2608 = vmatprep.mubr.msk.bf16.mxu0 %vm1518_vm3, %v1602_v18 }
 0x4b6   : > { %2606 = vmatprep.subr.bf16.mxu0 %v2883_v20 }
 0x4b9   : > { %2607 = vmatpush3.bf16.msra.mxu0 %v2883_v20 }
 0x4bc   : > { %2609 = vmatmul.mubr.msk.bf16.vlgmr.msra.gmra.mrb[8].mxu0 %vm1518_vm3, %v1603_v23 }
 0x587   : > { %v2594_v28 = vpop.f32.mrb[4].mxu0 }
 0x588   : > { %v4670_v29 = vadd.f32 %v2594_v28, %v2507_v27  ;;  %v1447_v30 = vpop.f32.mrb[5].mxu0 }
 0x589   : > { %v4672_v31 = vadd.f32 %v2507_v27, %v1447_v30  ;;  %v2595_v32 = vpop.f32.mrb[6].mxu0 }
 0x58a   : > { %v1464_v33 = vmul.f32 %v4670_v29, %v4670_v29  ;;  %v4676_v34 = vadd.f32 %v2595_v32, %v2507_v27  ;;  %v1450_v35 = vpop.f32.mrb[7].mxu0 }
 0x58b   : > { %v1462_v36 = vmul.f32 %v4672_v31, %v4672_v31  ;;  %v4680_v37 = vadd.f32 %v2507_v27, %v1450_v35 }
 0x58c   : > { %v1468_v38 = vmul.f32 %v1464_v33, %v4670_v29  ;;  %v1465_v39 = vmul.f32 %v4676_v34, %v4676_v34 }
 0x58d   : > { %v1466_v40 = vmul.f32 %v1462_v36, %v4672_v31  ;;  %v1463_v41 = vmul.f32 %v4680_v37, %v4680_v37 }
 0x58e   : > { %v1472_v43 = vmul.f32 0.044715, %v1468_v38  ;;  %v1469_v44 = vmul.f32 %v1465_v39, %v4676_v34 }
 0x58f   : > { %v1470_v45 = vmul.f32 0.044715, %v1466_v40  ;;  %v1467_v46 = vmul.f32 %v1463_v41, %v4680_v37  ;;  %v2610_v47 = vpop.f32.mrb[8].mxu0 }
 0x590   : > { %v1476_v48 = vadd.f32 %v1472_v43, %v4670_v29  ;;  %v1473_v49 = vmul.f32 0.044715, %v1469_v44  ;;  %v4691_v50 = vadd.f32 %v2610_v47, %v2516_v42  ;;  %v1662_v51 = vpop.f32.mrb[9].mxu0 }
 0x591   : > { %v1474_v52 = vadd.f32 %v1470_v45, %v4672_v31  ;;  %v1471_v53 = vmul.f32 0.044715, %v1467_v46  ;;  %v4694_v54 = vadd.f32 %v2516_v42, %v1662_v51  ;;  %v2611_v55 = vpop.f32.mrb[10].mxu0 }
 0x592   : > { %v1480_v56 = vmul.f32 0.7978846, %v1476_v48  ;;  %v1477_v57 = vadd.f32 %v1473_v49, %v4676_v34  ;;  %v1679_v58 = vmul.f32 %v4691_v50, %v4691_v50  ;;  %v4699_v59 = vadd.f32 %v2611_v55, %v2516_v42  ;;  %v1665_v60 = vpop.f32.mrb[11].mxu0 }
 0x593   : > { %v1478_v61 = vmul.f32 0.7978846, %v1474_v52  ;;  %v1475_v62 = vadd.f32 %v1471_v53, %v4680_v37  ;;  %v1677_v63 = vmul.f32 %v4694_v54, %v4694_v54  ;;  %v4704_v0 = vadd.f32 %v2516_v42, %v1665_v60 }
 0x594   : > { %2896 = vtanh.f32 %v1480_v56  ;;  %v1481_v3 = vmul.f32 0.7978846, %v1477_v57  ;;  %v1683_v4 = vmul.f32 %v1679_v58, %v4691_v50  ;;  %v1680_v7 = vmul.f32 %v4699_v59, %v4699_v59 }
 0x595   : > { %2898 = vtanh.f32 %v1478_v61  ;;  %v1479_v8 = vmul.f32 0.7978846, %v1475_v62  ;;  %v1681_v9 = vmul.f32 %v1677_v63, %v4694_v54  ;;  %v1678_v10 = vmul.f32 %v4704_v0, %v4704_v0 }
 0x596   : > { %2900 = vtanh.f32 %v1481_v3  ;;  %v1687_v17 = vmul.f32 0.044715, %v1683_v4  ;;  %v1684_v18 = vmul.f32 %v1680_v7, %v4699_v59 }
 0x597   : > { %2902 = vtanh.f32 %v1479_v8  ;;  %v1685_v19 = vmul.f32 0.044715, %v1681_v9  ;;  %v1682_v20 = vmul.f32 %v1678_v10, %v4704_v0 }
 0x598   : > { %v1691_v23 = vadd.f32 %v1687_v17, %v4691_v50  ;;  %v1688_v24 = vmul.f32 0.044715, %v1684_v18 }
 0x599   : > { %v1689_v25 = vadd.f32 %v1685_v19, %v4694_v54  ;;  %v1686_v27 = vmul.f32 0.044715, %v1682_v20  ;;  %v2887_v20 = vld [vmem:[#allocation19] sm:$0xff]  }
 0x59a   : > { %v1695_v28 = vmul.f32 0.7978846, %v1691_v23  ;;  %v1692_v30 = vadd.f32 %v1688_v24, %v4699_v59  ;;  %2618 = vmatprep.subr.bf16.mxu0 %v2887_v20  ;;  %v1383_v23 = vld [vmem:[%s4567_s25 + $0x10] sm:$0xff] }
 0x59b   : > { %v1693_v32 = vmul.f32 0.7978846, %v1689_v25  ;;  %v1690_v33 = vadd.f32 %v1686_v27, %v4704_v0  ;;  %2619 = vmatpush3.bf16.msra.mxu0 %v2887_v20  ;;  %v1384_v27 = vld [vmem:[%s4567_s25 + $0x18] sm:$0xff] }
 0x59c   : > { %2904 = vtanh.f32 %v1695_v28  ;;  %v1696_v35 = vmul.f32 0.7978846, %v1692_v30 }
 0x59d   : > { %2906 = vtanh.f32 %v1693_v32  ;;  %v1694_v36 = vmul.f32 0.7978846, %v1690_v33  ;;  %v1382_v32 = vld [vmem:[%s4567_s25 + $0x8] sm:$0xff] }
 0x59e   : > { %v2897_v38 = vpop.eup %2896  ;;  %2908 = vtanh.f32 %v1696_v35 }
 0x59f   : > { %v2899_v39 = vpop.eup %2898  ;;  %v1488_v40 = vadd.f32 1.0, %v2897_v38  ;;  %2910 = vtanh.f32 %v1694_v36 }
 0x5a0   : > { %v2901_v41 = vpop.eup %2900  ;;  %v1486_v42 = vadd.f32 1.0, %v2899_v39 }
 0x5a1   : > { %v2903_v43 = vpop.eup %2902  ;;  %v1492_v44 = vmul.f32 0.5, %v1488_v40  ;;  %v1489_v45 = vadd.f32 1.0, %v2901_v41 }
 0x5a2   : > { %v1490_v46 = vmul.f32 0.5, %v1486_v42  ;;  %v1487_v47 = vadd.f32 1.0, %v2903_v43  ;;  %v2521_v42 = vld [vmem:[#allocation17] ss:$0 sm:$0xff] }
 0x5a3   : > { %v1493_v48 = vmul.f32 0.5, %v1489_v45  ;;  %v1496_v51 = vmul.f32 %v1492_v44, %v4670_v29  ;;  %v1592_v44 = vld [vmem:[%s4545_s28 + $0x10] sm:$0xff] }
 0x5a4   : > { %v1491_v49 = vmul.f32 0.5, %v1487_v47  ;;  %v1494_v55 = vmul.f32 %v1490_v46, %v4672_v31  ;;  %v1590_v46 = vld [vmem:[%s4545_s28] sm:$0xff] }
 0x5a5   : > { %v1497_v52 = vmul.f32 %v1493_v48, %v4676_v34 }
 0x5a6   : > { %v2905_v53 = vpop.eup %2904  ;;  %v1495_v56 = vmul.f32 %v1491_v49, %v4680_v37  ;;  %v1593_v49 = vld [vmem:[%s4545_s28 + $0x18] sm:$0xff] }
 0x5a7   : > { %v2907_v57 = vpop.eup %2906  ;;  %v1499_v58 = vpack.c.bf16 %v1497_v52, %v1496_v51  ;;  %v1703_v60 = vadd.f32 1.0, %v2905_v53 }
 0x5a8   : > { %v2909_v61 = vpop.eup %2908  ;;  %v1701_v62 = vadd.f32 1.0, %v2907_v57  ;;  %v1498_v63 = vpack.c.bf16 %v1495_v56, %v1494_v55 }
 0x5a9   : > { %v2911_v3 = vpop.eup %2910  ;;  %v1707_v4 = vmul.f32 0.5, %v1703_v60  ;;  %v1704_v7 = vadd.f32 1.0, %v2909_v61 }
 0x5aa   : > { %v1705_v8 = vmul.f32 0.5, %v1701_v62  ;;  %v1702_v9 = vadd.f32 1.0, %v2911_v3  ;;  %2600 = vmatprep.mubr.msk.bf16.mxu1 %vm1518_vm3, %v1498_v63 }
 0x5ab   : > { %v1708_v29 = vmul.f32 0.5, %v1704_v7  ;;  %2601 = vmatmul.mubr.msk.bf16.vlgmr.msra.gmra.mrb[4].mxu1 %vm1518_vm3, %v1499_v58  ;;  %v1711_v34 = vmul.f32 %v1707_v4, %v4691_v50 }
 0x5ac   : > { %v1706_v31 = vmul.f32 0.5, %v1702_v9  ;;  %2613 = vmatpush3.bf16.msra.mxu1 %v4667_v26  ;;  %v1709_v10 = vmul.f32 %v1705_v8, %v4694_v54  ;;  %v2511_v26 = vld [vmem:[#allocation35] ss:$0 sm:$0xff] }
 0x5ad   : > { %v1712_v37 = vmul.f32 %v1708_v29, %v4699_v59  ;;  %v1381_v59 = vld [vmem:[%s4567_s25] sm:$0xff] }
 0x5ae   : > { %v1710_v17 = vmul.f32 %v1706_v31, %v4704_v0 }
 0x5af   : > { %v1714_v18 = vpack.c.bf16 %v1712_v37, %v1711_v34 }
 0x5b0   : > { %v1713_v19 = vpack.c.bf16 %v1710_v17, %v1709_v10 }
 0x5b2   : > { %2614 = vmatprep.mubr.msk.bf16.mxu1 %vm1321_vm2, %v1713_v19 }
 0x5b3   : > { %2615 = vmatmul.mubr.msk.bf16.vlgmr.msra.gmra.mrb[8].mxu1 %vm1321_vm2, %v1714_v18 }
 0x67e   : > { %v2602_v50 = vpop.f32.mrb[4].mxu1 }
 0x67f   : > { %v1568_v24 = vadd.f32 %v2602_v50, %v2511_v26  ;;  %v1559_v54 = vpop.f32.mrb[5].mxu1 }
 0x680   : > { %v1560_v25 = vadd.f32 %v2511_v26, %v1559_v54  ;;  %v2603_v0 = vpop.f32.mrb[6].mxu1 }
 0x681   : > { %v1576_v28 = vadd.f32 %v1568_v24, %v1383_v23  ;;  %v1571_v30 = vadd.f32 %v2603_v0, %v2511_v26  ;;  %v1562_v33 = vpop.f32.mrb[7].mxu1 }
 0x682   : > { %v1574_v35 = vadd.f32 %v1560_v25, %v1381_v59  ;;  %v1563_v36 = vadd.f32 %v2511_v26, %v1562_v33 }
 0x683   : > { %v1584_v38 = vadd.f32 %v4659_v21, %v1576_v28  ;;  %v1577_v39 = vadd.f32 %v1571_v30, %v1384_v27 }
 0x684   : > { %v1582_v40 = vadd.f32 %v4638_v12, %v1574_v35  ;;  %v1575_v41 = vadd.f32 %v1563_v36, %v1382_v32 }
 0x685   : > { %1588 = vst.msk [vmem:[%s4738_s0 + $0x10] sm:$0xff] %vm1518_vm3, %v1584_v38  ;;  %v1585_v43 = vadd.f32 %v4662_v22, %v1577_v39  ;;  %v1591_v22 = vld [vmem:[%s4545_s28 + $0x8] sm:$0xff]  ;;  %s3554_s28 = scalar_lea.vmem %s3553_s19, 1024 }
 0x686   : > { %1586 = vst.msk [vmem:[%s4738_s0] sm:$0xff] %vm1518_vm3, %v1582_v40  ;;  %v1583_v21 = vadd.f32 %v4641_v13, %v1575_v41  ;;  %v2616_v12 = vpop.f32.mrb[8].mxu1  ;;  %p3556_p2 = scmp.lt.s32.totalorder %s3554_s28, %s3548_s15 }
 0x687   : > { %1589 = vst.msk [vmem:[%s4738_s0 + $0x18] sm:$0xff] %vm1518_vm3, %v1585_v43  ;;  %v1776_v45 = vadd.f32 %v2616_v12, %v2521_v42  ;;  %v1767_v47 = vpop.f32.mrb[9].mxu1 }
 0x688   : > { %1587 = vst.msk [vmem:[%s4738_s0 + $0x8] sm:$0xff] %vm1518_vm3, %v1583_v21  ;;  %v1768_v48 = vadd.f32 %v2521_v42, %v1767_v47  ;;  %v2617_v51 = vpop.f32.mrb[10].mxu1  ;;  %p3557_p13 = por %p3556_p2, %p3555_p8 }
 0x689   : > { %v1784_v52 = vadd.f32 %v1776_v45, %v1592_v44  ;;  %v1779_v53 = vadd.f32 %v2617_v51, %v2521_v42  ;;  %v1770_v55 = vpop.f32.mrb[11].mxu1 }
 0x68a   : > { %v1782_v56 = vadd.f32 %v1768_v48, %v1590_v46  ;;  %v1771_v57 = vadd.f32 %v2521_v42, %v1770_v55  ;;  %p3558_p10 = pnand %p3557_p13, %p3551_p12 }
 0x68b   : > { %v1788_v13 = vadd.f32 %v1784_v52, %v4647_v16  ;;  %v1785_v58 = vadd.f32 %v1779_v53, %v1593_v49 }
 0x68c   : > { %v1786_v60 = vadd.f32 %v1782_v56, %v4643_v14  ;;  %v1783_v61 = vadd.f32 %v1771_v57, %v1591_v22  ;;  %v1801_v14 = vld [vmem:[#allocation22] sm:$0xf] }
 0x68d   : > { %1792 = vst.msk [vmem:[%s4757_s23 + $0x10] sm:$0xff] %vm1321_vm2, %v1788_v13  ;;  %v1789_v62 = vadd.f32 %v1785_v58, %v4635_v11  ;;  %v1804_v63 = vpack.c.bf16 %v1785_v58, %v1784_v52  ;;  %2631 = vmatprep.subr.msk.bf16.mxu1 %vm1218_vm0, %v1801_v14  ;;  %v1923_v4 = vsel %vm1218_vm0, %v1801_v14, 0  ;;  %v2525_v11 = vld [vmem:[#allocation20] ss:$0 sm:$0xff] }
 0x68e   : > { %1790 = vst.msk [vmem:[%s4757_s23] sm:$0xff] %vm1321_vm2, %v1786_v60  ;;  %v1787_v3 = vadd.f32 %v1783_v61, %v4645_v15  ;;  %v1803_v16 = vpack.c.bf16 %v1783_v61, %v1782_v56  ;;  %2625 = vmatpush3.bf16.msra.mxu1 %v1923_v4 }
 0x68f   : > { %1793 = vst.msk [vmem:[%s4757_s23 + $0x18] sm:$0xff] %vm1321_vm2, %v1789_v62 }
 0x690   : > { %1791 = vst.msk [vmem:[%s4757_s23 + $0x8] sm:$0xff] %vm1321_vm2, %v1787_v3  ;;  %2620 = vmatprep.mubr.msk.bf16.mxu0 %vm1321_vm2, %v1803_v16 }
 0x691   : > { %2621 = vmatmul.mubr.msk.bf16.vlgmr.msra.gmra.mrb[12].mxu0 %vm1321_vm2, %v1804_v63 }
 0x764   : > { %v2622_v7 = vpop.f32.mrb[12].mxu0 }
 0x765   : > { %v1866_v8 = vadd.f32 %v2622_v7, %v2525_v11  ;;  %v1857_v9 = vpop.f32.mrb[13].mxu0 }
 0x766   : > { %v1858_v15 = vadd.f32 %v2525_v11, %v1857_v9  ;;  %v2623_v29 = vpop.f32.mrb[14].mxu0 }
 0x767   : > { %v1874_v31 = vmul.f32 %v1866_v8, %v1866_v8  ;;  %v1869_v34 = vadd.f32 %v2623_v29, %v2525_v11  ;;  %v1860_v37 = vpop.f32.mrb[15].mxu0 }
 0x768   : > { %v1872_v10 = vmul.f32 %v1858_v15, %v1858_v15  ;;  %v1861_v17 = vadd.f32 %v2525_v11, %v1860_v37 }
 0x769   : > { %v1878_v18 = vmul.f32 %v1874_v31, %v1866_v8  ;;  %v1875_v19 = vmul.f32 %v1869_v34, %v1869_v34 }
 0x76a   : > { %v1876_v20 = vmul.f32 %v1872_v10, %v1858_v15  ;;  %v1873_v26 = vmul.f32 %v1861_v17, %v1861_v17 }
 0x76b   : > { %v1882_v23 = vmul.f32 0.044715, %v1878_v18  ;;  %v1879_v50 = vmul.f32 %v1875_v19, %v1869_v34 }
 0x76c   : > { %v1880_v24 = vmul.f32 0.044715, %v1876_v20  ;;  %v1877_v59 = vmul.f32 %v1873_v26, %v1861_v17 }
 0x76d   : > { %v1886_v54 = vadd.f32 %v1882_v23, %v1866_v8  ;;  %v1883_v25 = vmul.f32 0.044715, %v1879_v50 }
 0x76e   : > { %v1884_v27 = vadd.f32 %v1880_v24, %v1858_v15  ;;  %v1881_v0 = vmul.f32 0.044715, %v1877_v59 }
 0x76f   : > { %v1890_v28 = vmul.f32 0.7978846, %v1886_v54  ;;  %v1887_v30 = vadd.f32 %v1883_v25, %v1869_v34 }
 0x770   : > { %v1888_v32 = vmul.f32 0.7978846, %v1884_v27  ;;  %v1885_v33 = vadd.f32 %v1881_v0, %v1861_v17 }
 0x771   : > { %2912 = vtanh.f32 %v1890_v28  ;;  %v1891_v35 = vmul.f32 0.7978846, %v1887_v30 }
 0x772   : > { %2914 = vtanh.f32 %v1888_v32  ;;  %v1889_v36 = vmul.f32 0.7978846, %v1885_v33 }
 0x773   : > { %2916 = vtanh.f32 %v1891_v35 }
 0x774   : > { %2918 = vtanh.f32 %v1889_v36 }
 0x77b   : > { %v2913_v38 = vpop.eup %2912 }
 0x77c   : > { %v2915_v39 = vpop.eup %2914  ;;  %v1898_v40 = vadd.f32 1.0, %v2913_v38 }
 0x77d   : > { %v2917_v41 = vpop.eup %2916  ;;  %v1896_v42 = vadd.f32 1.0, %v2915_v39 }
 0x77e   : > { %v2919_v43 = vpop.eup %2918  ;;  %v1902_v21 = vmul.f32 0.5, %v1898_v40  ;;  %v1899_v44 = vadd.f32 1.0, %v2917_v41 }
 0x77f   : > { %v1900_v12 = vmul.f32 0.5, %v1896_v42  ;;  %v1897_v45 = vadd.f32 1.0, %v2919_v43 }
 0x780   : > { %v1903_v46 = vmul.f32 0.5, %v1899_v44  ;;  %v1906_v48 = vmul.f32 %v1902_v21, %v1866_v8 }
 0x781   : > { %v1901_v47 = vmul.f32 0.5, %v1897_v45  ;;  %v1904_v51 = vmul.f32 %v1900_v12, %v1858_v15 }
 0x782   : > { %v1907_v49 = vmul.f32 %v1903_v46, %v1869_v34 }
 0x783   : > { %v1905_v52 = vmul.f32 %v1901_v47, %v1861_v17 }
 0x784   : > { %v1909_v53 = vpack.c.bf16 %v1907_v49, %v1906_v48 }
 0x785   : > { %v1908_v22 = vpack.c.bf16 %v1905_v52, %v1904_v51 }
 0x787   : > { %2626 = vmatprep.mubr.msk.bf16.mxu1 %vm1211_vm1, %v1908_v22 }
 0x788   : > { %2627 = vmatmul.mubr.msk.bf16.vlgmr.msra.gmra.mrb[12].mxu1 %vm1211_vm1, %v1909_v53 }
 0x789   : > { %3561 = shalt.err (!%p3558_p10)
}
 0x78a   : > { %s3562_s1 = scalar_lea.hbm %s4782_s2, 512  ;;  %s3566_s7 = scalar_lea.hbm %s5093_s30, 1024 }
 0x78b   : > { %p3563_p7 = scmp.ne.s32.totalorder %s4782_s2, %s3562_s1  ;;  %p3567_p0 = scmp.lt.u32.totalorder %s4782_s2, %s5093_s30 }
 0x78c   : > { %p3568_p5 = scmp.lt.u32.totalorder %s3566_s7, %s3562_s1  ;;  %p3570_p3 = scmp.lt.u32.totalorder %s3562_s1, %s4782_s2 }
 0x78d   : > { %p3564_p1 = pnand %p3563_p7, %p5094_p6 }
 0x78e   : > { %p3569_p9 = por %p3568_p5, %p3567_p0 }
 0x78f   : > { %p3565_p4 = pneg %p3564_p1 }
 0x790   : > { %p3571_p11 = por %p3570_p3, %p3569_p9 }
 0x792   : > { %p3572_p12 = pnand %p3571_p11, %p3565_p4 }
 0x794   : > { %3575 = shalt.err (!%p3572_p12)
}
 0x795   : > { %s3751_s22 = smov 128   ;;  %s3752_s8 = smov 8  }
 0x796   : > { %2709 = dma.vmem_to_hbm [thread:$0]  (%p5094_p6), %s4785_s13, 512, %s4782_s2, %s1992_s20, %s3751_s22, %s3751_s22, %s3752_s8  }
 0x797   : > { %s5095_s19 = sld [smem:[#allocation84_spill]]  ;;  %s2010_s1 = sshll.u32 %s4738_s0, 4  ;;  %s4821_s1 = int_to_ptr.vmem [resolvable:$true] %s2010_s1 }
 0x798   : > { %s1987_s17 = scalar_lea.sflag [#allocation4], %s4527_s5  ;;  %s3576_s24 = scalar_lea.vmem %s4821_s1, 512 }
 0x799   : > { %p3577_p8 = scmp.ne.s32.totalorder %s4821_s1, %s3576_s24  ;;  %s3753_s7 = smov [#allocation37]  }
 0x79a   : > { %s3580_s25 = sshll.u32 %s3753_s7, 4  ;;  %s3581_s25 = int_to_ptr.vmem [resolvable:$false] %s3580_s25 }
 0x79b   : > { %p3578_p2 = pnand %p3577_p8, %p5094_p6  ;;  %s3582_s2 = scalar_lea.vmem %s3581_s25, 1024 }
 0x79c   : > { %p3583_p10 = scmp.lt.s32.totalorder %s4821_s1, %s3581_s25  ;;  %p3584_p7 = scmp.lt.s32.totalorder %s3582_s2, %s3576_s24 }
 0x79d   : > { %s4818_s28 = scalar_lea.hbm %s5095_s19, %s4776_s12  ;;  %p3579_p13 = pneg %p3578_p2 }
 0x79e   : > { %p3585_p1 = por %p3584_p7, %p3583_p10 }
 0x7a0   : > { %p3586_p4 = pnand %p3585_p1, %p3579_p13 }
 0x7a2   : > { %3589 = shalt.err (!%p3586_p4)
}
 0x7a3   : > { %s3590_s0 = scalar_lea.hbm %s4818_s28, 512  ;;  %s3594_s15 = scalar_lea.hbm %s5095_s19, 1024 }
 0x7a4   : > { %p3591_p0 = scmp.ne.s32.totalorder %s4818_s28, %s3590_s0  ;;  %p3595_p3 = scmp.lt.u32.totalorder %s4818_s28, %s5095_s19 }
 0x7a5   : > { %p3596_p11 = scmp.lt.u32.totalorder %s3594_s15, %s3590_s0  ;;  %p3598_p8 = scmp.lt.u32.totalorder %s3590_s0, %s4818_s28 }
 0x7a6   : > { %p3592_p5 = pnand %p3591_p0, %p5094_p6 }
 0x7a7   : > { %p3597_p12 = por %p3596_p11, %p3595_p3 }
 0x7a8   : > { %p3593_p9 = pneg %p3592_p5 }
 0x7a9   : > { %p3599_p2 = por %p3598_p8, %p3597_p12 }
 0x7ab   : > { %p3600_p13 = pnand %p3599_p2, %p3593_p9 }
 0x7ad   : > { %3603 = shalt.err (!%p3600_p13)
}
 0x7ae   : > { %2708 = dma.vmem_to_hbm [thread:$0]  (%p5094_p6), %s4821_s1, 512, %s4818_s28, %s1987_s17, %s3751_s22, %s3751_s22, %s3752_s8   ;;  %v2529_v55 = vld [vmem:[#allocation23] ss:$0 sm:$0xff] }
 0x7af   : > { %v1796_v56 = vld [vmem:[%s4552_s10 + $0x10] sm:$0xff]  ;;  %v1794_v58 = vld [vmem:[%s4552_s10] sm:$0xff]  ;;  %v1797_v62 = vld [vmem:[%s4552_s10 + $0x18] sm:$0xff]  ;;  %s1179_s5 = scalar_lea.vmem [#allocation40], %s4530_s3  ;;  %s5096_s1 = sld [smem:[#allocation86_spill]] }
 0x7b0   : > { %v1795_v14 = vld [vmem:[%s4552_s10 + $0x8] sm:$0xff]  ;;  %s2042_s28 = sshll.u32 %s1179_s5, 4  ;;  %s3754_s25 = smov [#allocation40]   ;;  %s4859_s28 = int_to_ptr.vmem [resolvable:$true] %s2042_s28 }
 0x7b1   : > { %s3604_s24 = scalar_lea.vmem %s4859_s28, 512  ;;  %s3608_s2 = sshll.u32 %s3754_s25, 4  ;;  %s3609_s2 = int_to_ptr.vmem [resolvable:$false] %s3608_s2 }
 0x7b2   : > { %p3605_p10 = scmp.ne.s32.totalorder %s4859_s28, %s3604_s24  ;;  %s3610_s0 = scalar_lea.vmem %s3609_s2, 1024 }
 0x7b3   : > { %p3611_p4 = scmp.lt.s32.totalorder %s4859_s28, %s3609_s2  ;;  %p3612_p0 = scmp.lt.s32.totalorder %s3610_s0, %s3604_s24 }
 0x7b4   : > { %p3606_p7 = pnand %p3605_p10, %p5094_p6 }
 0x7b5   : > { %s4867_s17 = scalar_lea.hbm %s5096_s1, %s4776_s12  ;;  %p3613_p5 = por %p3612_p0, %p3611_p4 }
 0x7b6   : > { %p3607_p1 = pneg %p3606_p7 }
 0x7b8   : > { %p3614_p9 = pnand %p3613_p5, %p3607_p1 }
 0x85b   : > { %v2628_v57 = vpop.f32.mrb[12].mxu1 }
 0x85c   : > { %v1968_v13 = vadd.f32 %v2628_v57, %v2529_v55  ;;  %v1959_v60 = vpop.f32.mrb[13].mxu1 }
 0x85d   : > { %v1960_v61 = vadd.f32 %v2529_v55, %v1959_v60  ;;  %v2629_v63 = vpop.f32.mrb[14].mxu1 }
 0x85e   : > { %v1976_v3 = vadd.f32 %v1968_v13, %v1796_v56  ;;  %v1971_v16 = vadd.f32 %v2629_v63, %v2529_v55  ;;  %v1962_v4 = vpop.f32.mrb[15].mxu1 }
 0x85f   : > { %v1974_v11 = vadd.f32 %v1960_v61, %v1794_v58  ;;  %v1963_v7 = vadd.f32 %v2529_v55, %v1962_v4 }
 0x860   : > { %v1980_v8 = vadd.f32 %v1976_v3, %v4620_v5  ;;  %v1977_v9 = vadd.f32 %v1971_v16, %v1797_v62 }
 0x861   : > { %v1978_v15 = vadd.f32 %v1974_v11, %v4610_v1  ;;  %v1975_v29 = vadd.f32 %v1963_v7, %v1795_v14 }
 0x862   : > { %1984 = vst.msk [vmem:[%s1179_s5 + $0x10] sm:$0xff] %vm1211_vm1, %v1980_v8  ;;  %v1981_v31 = vadd.f32 %v1977_v9, %v4623_v6 }
 0x863   : > { %1982 = vst.msk [vmem:[%s1179_s5] sm:$0xff] %vm1211_vm1, %v1978_v15  ;;  %v1979_v5 = vadd.f32 %v1975_v29, %v4613_v2 }
 0x864   : > { %1985 = vst.msk [vmem:[%s1179_s5 + $0x18] sm:$0xff] %vm1211_vm1, %v1981_v31 }
 0x865   : > { %1983 = vst.msk [vmem:[%s1179_s5 + $0x8] sm:$0xff] %vm1211_vm1, %v1979_v5 }
 0x866   : > { %3617 = shalt.err (!%p3614_p9)
}
 0x867   : > { %s3618_s12 = scalar_lea.hbm %s4867_s17, 512  ;;  %s3622_s15 = scalar_lea.hbm %s5096_s1, 1024 }
 0x868   : > { %p3619_p3 = scmp.ne.s32.totalorder %s4867_s17, %s3618_s12  ;;  %p3623_p8 = scmp.lt.u32.totalorder %s4867_s17, %s5096_s1 }
 0x869   : > { %p3624_p2 = scmp.lt.u32.totalorder %s3622_s15, %s3618_s12  ;;  %p3626_p10 = scmp.lt.u32.totalorder %s3618_s12, %s4867_s17 }
 0x86a   : > { %p3620_p11 = pnand %p3619_p3, %p5094_p6 }
 0x86b   : > { %p3625_p13 = por %p3624_p2, %p3623_p8 }
 0x86c   : > { %p3621_p12 = pneg %p3620_p11 }
 0x86d   : > { %p3627_p7 = por %p3626_p10, %p3625_p13 }
 0x86f   : > { %p3628_p1 = pnand %p3627_p7, %p3621_p12 }
 0x871   : > { %3631 = shalt.err (!%p3628_p1)
}
 0x872   : > { %2710 = dma.vmem_to_hbm [thread:$0]  (%p5094_p6), %s4859_s28, 512, %s4867_s17, %s1992_s20, %s3751_s22, %s3751_s22, %s3752_s8  }
 0x873 PF: > { %s5097_s5 = sld [smem:[#allocation56_spill]]  ;;  %s5098_s10 = sld [smem:[#allocation61_spill]] }
 0x874   : > { %s5099_s3 = sld [smem:[#allocation57_spill]] }
 0x879   : > { %s2057_s24 = sand.u32 1, %s5097_s5   ;;  %p5100_p4 = scmp.ne.s32.totalorder %s5098_s10, 0 }
 0x87a   : > { %p5101_p0 = scmp.ge.s32.totalorder %s5099_s3, 2  ;;  %s2058_s25 = scalar_lea.sflag [#allocation4], %s2057_s24 }
 0x87c   : > { %p2783_p5 = pnand %p5101_p0, %p5100_p4 }
 0x87e   : > { %3701 = dma.done.wait (!%p2783_p5), %s2058_s25, 512  }
 0x87f   : > { %3703 = vsyncadd (!%p2783_p5), %s2058_s25, 4294966784  ;;  %s5102_s16 = sadd.s32 4294967294, %s5099_s3  }
 0x880   : > { %s2066_s2 = sand.u32 1, %s5102_s16  }
 0x881   : > { %s2067_s0 = scalar_lea.sflag [#allocation39], %s2066_s2 }
 0x882   : > { %3705 = dma.done.wait (!%p2783_p5), %s2067_s0, 1024  }
 0x883   : > { %3707 = vsyncadd (!%p2783_p5), %s2067_s0, 4294966272  ;;  %s5103_s28 = sld [smem:[#allocation59_spill]]  ;;  %s5104_s4 = sld [smem:[#allocation60_spill]] }
 0x884   : > { %s5105_s5 = smov %s3714_s26  ;;  %s5106_s26 = smov %s3718_s27 }
 0x889   : > { %p58_p6 = scmp.ge.s32.totalorder %s5103_s28, 4   ;;  %s5107_s27 = smov %s5104_s4 }
 0x88b   :  { %60 = sbr.rel (!%p58_p6) target bundleno = 47 (0x2f), region = 310 }
 0x892   :  { %2081 = vsyncpa [#allocation3], 1 }
 0x893   :  { %2083 = vsyncpa [#allocation3 + $0x1], 1 }
 0x894   :  { %2084 = vsyncpa [#allocation6], 1 }
 0x895   :  { %2086 = vsyncpa [#allocation6 + $0x1], 1 }
 0x896   :  { %2087 = vsyncpa [#allocation9], 1 }
 0x897   :  { %2089 = vsyncpa [#allocation9 + $0x1], 1 }
 0x898   :  { %2090 = vsyncpa [#allocation12], 1 }
 0x899   :  { %2092 = vsyncpa [#allocation12 + $0x1], 1 }
 0x89a   :  { %2093 = vsyncpa [#allocation15], 1 }
 0x89b   :  { %2094 = vsyncpa [#allocation18], 1 }
 0x89c   :  { %2095 = vsyncpa [#allocation21], 1 }
 0x89d   :  { %2096 = vsyncpa [#allocation24], 1 }
 0x89e   :  { %2097 = vsyncpa [#allocation27], 1 }
 0x89f   :  { %2098 = vsyncpa [#allocation30], 1 }
 0x8a0   :  { %2099 = vsyncpa [#allocation33], 1 }
 0x8a1   :  { %2100 = vsyncpa [#allocation36], 1 }
 0x8a2   :  { %2101 = vsyncpa [#allocation4], 1 }
 0x8a3   :  { %2103 = vsyncpa [#allocation4 + $0x1], 1 }
 0x8a4   :  { %2104 = vsyncpa [#allocation39], 1 }
 0x8a5   :  { %2106 = vsyncpa [#allocation39 + $0x1], 1 }

</bundles_post_ra>
